<compile_context>
chip_gen: v7x
topology: tpu7x:2x2x1
jax: 0.10.0
libtpu: 0.0.40
codegen_flags: <defaults>
</compile_context>

<pallas_src>
import functools

import jax
import jax.numpy as jnp
from jax.experimental import pallas as pl
from jax.experimental.pallas import tpu as pltpu

# ---- small, deterministic "RNNTParam"-style config -------------------------
SOS = -1                 # RNNT SOS sentinel (negative => one-hot row is all zero)
NUM_LABELS = 17          # => embedding has NUM_LABELS - 1 = 16 rows
PRED_HIDDEN = 32         # pred_hidden_size (small for the demo)
PRED_LAYERS = 2          # pred_num_layers
U, N = 8, 2              # seq length, batch


# ---------------------------------------------------------------------------
# Fused Prediction kernel: embedding (one-hot matmul) + multi-layer LSTM
# ---------------------------------------------------------------------------
def _prediction_kernel(ids_ref, embed_ref, wih_ref, whh_ref, b_ref,
                       h0_ref, c0_ref, g_ref, hg_ref, cg_ref, xp_scr,
                       *, seq, batch, hidden, layers, vocab):
    """All refs are 2-D, full-array VMEM blocks.

    ids   : {seq*batch, 1} int32          (SOS kept as -1)
    embed : {vocab, C}
    wih   : {layers*C, 4C}  columns ordered [i | f | g | o]  (= W_ih^T stacked)
    whh   : {layers*C, 4C}  (= W_hh^T stacked)
    b     : {layers, 4C}    (= b_ih + b_hh)
    h0/c0 : {layers*batch, C}
    g     : {seq*batch, C}   (last layer's per-step outputs)
    hg/cg : {layers*batch, C}
    xp_scr: {seq*batch, 4C}  f32 scratch for the hoisted input projection
    """
    f32 = jnp.float32
    C = hidden

    # --- Embedding + SOS masking as a one-hot matmul -------------------------
    # SOS (= -1) matches no class in [0, vocab), so its one-hot row is all
    # zeros and the embedded row is exactly 0.0 -- this reproduces
    # masked_fill(sos, 0) -> embed -> masked_fill_(sos, 0.0).
    ids = ids_ref[...]                                               # (S*B, 1) int32
    classes = jax.lax.broadcasted_iota(jnp.int32, (seq * batch, vocab), 1)
    onehot = jnp.where(ids == classes, 1.0, 0.0)                     # (S*B, V) f32
    x_all = jnp.dot(onehot, embed_ref[...].astype(f32),
                    preferred_element_type=f32)                      # (S*B, C)

    # --- Multi-layer LSTM ----------------------------------------------------
    for l in range(layers):
        wih = wih_ref[l * C:(l + 1) * C, :].astype(f32)              # (C, 4C)
        whh = whh_ref[l * C:(l + 1) * C, :].astype(f32)              # (C, 4C)
        b = b_ref[l:l + 1, :].astype(f32)                            # (1, 4C)

        # Hoisted input projection for every timestep: one MXU pass per layer.
        xp_scr[...] = jnp.dot(x_all, wih, preferred_element_type=f32) + b

        h = h0_ref[l * batch:(l + 1) * batch, :].astype(f32)         # (B, C)
        c = c0_ref[l * batch:(l + 1) * batch, :].astype(f32)         # (B, C)

        # Static unroll of the serial recurrence: only h @ W_hh^T + gates here.
        for t in range(seq):
            gates = (xp_scr[t * batch:(t + 1) * batch, :] +
                     jnp.dot(h, whh, preferred_element_type=f32))    # (B, 4C)
            sig = jax.nn.sigmoid(gates)    # one full-vreg EUP pass (i, f, o)
            tnh = jnp.tanh(gates)          # one full-vreg EUP pass (g)
            i_g = sig[:, 0 * C:1 * C]
            f_g = sig[:, 1 * C:2 * C]
            g_g = tnh[:, 2 * C:3 * C]
            o_g = sig[:, 3 * C:4 * C]
            c = f_g * c + i_g * g_g
            h = o_g * jnp.tanh(c)
            # Per-step layer output (last layer's writes are the final result).
            g_ref[t * batch:(t + 1) * batch, :] = h

        # Final hidden/cell state: written once per layer (not per step).
        hg_ref[l * batch:(l + 1) * batch, :] = h
        cg_ref[l * batch:(l + 1) * batch, :] = c

        if l + 1 < layers:
            # This layer's full-sequence output feeds the next layer's hoisted
            # input projection (g_ref doubles as the inter-layer buffer).
            x_all = g_ref[...]


# ---------------------------------------------------------------------------
# Prediction.forward  (fp32 path, enable_bf16=False)
# ---------------------------------------------------------------------------
@jax.jit
def prediction_forward(pre_g, pre_hg, pre_cg, params):
    """pre_g: {U, N} int32; pre_hg/pre_cg: {L, N, C}.  Returns (g, hg, cg)."""
    seq, batch = pre_g.shape
    layers, _, hidden = pre_hg.shape
    vocab = params["embed"].shape[0]

    ids = pre_g.astype(jnp.int32).reshape(seq * batch, 1)
    wih = params["wih_t"].reshape(layers * hidden, 4 * hidden)
    whh = params["whh_t"].reshape(layers * hidden, 4 * hidden)
    b = params["b"].reshape(layers, 4 * hidden)
    h0 = pre_hg.reshape(layers * batch, hidden)
    c0 = pre_cg.reshape(layers * batch, hidden)

    kernel = functools.partial(
        _prediction_kernel, seq=seq, batch=batch, hidden=hidden,
        layers=layers, vocab=vocab)

    full2d = lambda shape: pl.BlockSpec(shape, lambda i: (0, 0))

    g_flat, hg_flat, cg_flat = pl.pallas_call(
        kernel,
        out_shape=(
            jax.ShapeDtypeStruct((seq * batch, hidden), jnp.float32),
            jax.ShapeDtypeStruct((layers * batch, hidden), jnp.float32),
            jax.ShapeDtypeStruct((layers * batch, hidden), jnp.float32),
        ),
        grid_spec=pltpu.PrefetchScalarGridSpec(
            num_scalar_prefetch=0,
            grid=(1,),                                   # single fused invocation
            in_specs=[
                full2d((seq * batch, 1)),                # ids
                full2d((vocab, hidden)),                 # embedding table
                full2d((layers * hidden, 4 * hidden)),   # W_ih^T (stacked)
                full2d((layers * hidden, 4 * hidden)),   # W_hh^T (stacked)
                full2d((layers, 4 * hidden)),            # bias (b_ih + b_hh)
                full2d((layers * batch, hidden)),        # h0
                full2d((layers * batch, hidden)),        # c0
            ],
            out_specs=(
                full2d((seq * batch, hidden)),           # g
                full2d((layers * batch, hidden)),        # hg
                full2d((layers * batch, hidden)),        # cg
            ),
            scratch_shapes=[
                pltpu.VMEM((seq * batch, 4 * hidden), jnp.float32),  # hoisted x-proj
            ],
        ),
        compiler_params=pltpu.CompilerParams(
            dimension_semantics=("arbitrary",)),
    )(ids, params["embed"], wih, whh, b, h0, c0)

    return (g_flat.reshape(seq, batch, hidden),
            hg_flat.reshape(layers, batch, hidden),
            cg_flat.reshape(layers, batch, hidden))


# ---------------------------------------------------------------------------
# Pure-JAX reference (for a correctness sanity check)
# ---------------------------------------------------------------------------
def _lstm_layer_ref(x, h0, c0, wih_t, whh_t, b):
    C = h0.shape[-1]

    def step(carry, x_t):
        h, c = carry
        gates = x_t @ wih_t + h @ whh_t + b
        i_g = jax.nn.sigmoid(gates[:, 0 * C:1 * C])
        f_g = jax.nn.sigmoid(gates[:, 1 * C:2 * C])
        g_g = jnp.tanh(gates[:, 2 * C:3 * C])
        o_g = jax.nn.sigmoid(gates[:, 3 * C:4 * C])
        c = f_g * c + i_g * g_g
        h = o_g * jnp.tanh(c)
        return (h, c), h

    (hT, cT), ys = jax.lax.scan(step, (h0, c0), x)
    return ys, hT, cT


def prediction_forward_ref(pre_g, pre_hg, pre_cg, params):
    sos_mask = (pre_g == SOS)
    ids = jnp.where(sos_mask, 0, pre_g)
    g = jnp.take(params["embed"], ids, axis=0)
    g = jnp.where(sos_mask[:, :, None], jnp.zeros((), g.dtype), g)
    hg_out, cg_out = [], []
    x = g
    for layer in range(pre_hg.shape[0]):
        y, hT, cT = _lstm_layer_ref(
            x, pre_hg[layer], pre_cg[layer],
            params["wih_t"][layer], params["whh_t"][layer], params["b"][layer])
        hg_out.append(hT)
        cg_out.append(cT)
        x = y
    return x, jnp.stack(hg_out), jnp.stack(cg_out)


# ---------------------------------------------------------------------------
if __name__ == "__main__":
    key = jax.random.PRNGKey(0)
    k_emb, k_w, k_g, k_h, k_c = jax.random.split(key, 5)

    C = PRED_HIDDEN
    V = NUM_LABELS - 1
    bound = 1.0 / float(C) ** 0.5

    # Deterministic parameter init (Embedding ~ N(0,1); LSTM ~ U(-1/sqrt(C), 1/sqrt(C)))
    embed_w = jax.random.normal(k_emb, (V, C), jnp.float32)
    wih_t, whh_t, bias = [], [], []
    wk = k_w
    for _ in range(PRED_LAYERS):
        wk, k1, k2, k3, k4 = jax.random.split(wk, 5)
        w_ih = jax.random.uniform(k1, (4 * C, C), jnp.float32, -bound, bound)
        w_hh = jax.random.uniform(k2, (4 * C, C), jnp.float32, -bound, bound)
        b_ih = jax.random.uniform(k3, (4 * C,), jnp.float32, -bound, bound)
        b_hh = jax.random.uniform(k4, (4 * C,), jnp.float32, -bound, bound)
        wih_t.append(w_ih.T)                               # {C, 4C}
        whh_t.append(w_hh.T)                               # {C, 4C}
        bias.append(b_ih + b_hh)                           # {4C}
    params = {
        "embed": embed_w,                                  # {V, C}
        "wih_t": jnp.stack(wih_t),                         # {L, C, 4C}
        "whh_t": jnp.stack(whh_t),                         # {L, C, 4C}
        "b": jnp.stack(bias),                              # {L, 4C}
    }

    # Inputs: pre_g {U, N} with some SOS entries; pre_hg/pre_cg {L, N, C}
    pre_g = jax.random.randint(k_g, (U, N), 0, V, jnp.int32)
    pre_g = pre_g.at[0, :].set(SOS).at[3, 1].set(SOS)
    pre_hg = 0.1 * jax.random.normal(k_h, (PRED_LAYERS, N, C), jnp.float32)
    pre_cg = 0.1 * jax.random.normal(k_c, (PRED_LAYERS, N, C), jnp.float32)

    g_out, hg_out, cg_out = prediction_forward(pre_g, pre_hg, pre_cg, params)
    jax.block_until_ready((g_out, hg_out, cg_out))

    # Sanity check against the pure-JAX reference.
    g_ref, hg_ref, cg_ref = prediction_forward_ref(pre_g, pre_hg, pre_cg, params)
    assert g_out.shape == (U, N, C)
    assert hg_out.shape == (PRED_LAYERS, N, C) and cg_out.shape == (PRED_LAYERS, N, C)
    assert jnp.allclose(g_out, g_ref, atol=1e-4), "output mismatch"
    assert jnp.allclose(hg_out, hg_ref, atol=1e-4), "hidden-state mismatch"
    assert jnp.allclose(cg_out, cg_ref, atol=1e-4), "cell-state mismatch"

    print("KERNEL_OK")
</pallas_src>

<mosaic_0001>
module attributes {stable_mosaic.version = 11 : i64} {
  func.func @_prediction_kernel(%arg0: i32, %arg1: memref<16x1xi32, #tpu.memory_space<vmem>>, %arg2: memref<16x32xf32, #tpu.memory_space<vmem>>, %arg3: memref<64x128xf32, #tpu.memory_space<vmem>>, %arg4: memref<64x128xf32, #tpu.memory_space<vmem>>, %arg5: memref<2x128xf32, #tpu.memory_space<vmem>>, %arg6: memref<4x32xf32, #tpu.memory_space<vmem>>, %arg7: memref<4x32xf32, #tpu.memory_space<vmem>>, %arg8: memref<16x32xf32, #tpu.memory_space<vmem>>, %arg9: memref<4x32xf32, #tpu.memory_space<vmem>>, %arg10: memref<4x32xf32, #tpu.memory_space<vmem>>, %arg11: memref<16x128xf32, #tpu.memory_space<vmem>>) attributes {dimension_semantics = [#tpu.dimension_semantics<arbitrary>], iteration_bounds = array<i64: 1>, scalar_prefetch = 0 : i64, scratch_operands = 1 : i64, tpu.core_type = #tpu.core_type<tc>, window_params = [{pipeline_mode = #tpu.pipeline_mode<synchronous>, transform_indices = @transform_0, window_bounds = array<i64: 16, 1>}, {pipeline_mode = #tpu.pipeline_mode<synchronous>, transform_indices = @transform_1, window_bounds = array<i64: 16, 32>}, {pipeline_mode = #tpu.pipeline_mode<synchronous>, transform_indices = @transform_2, window_bounds = array<i64: 64, 128>}, {pipeline_mode = #tpu.pipeline_mode<synchronous>, transform_indices = @transform_3, window_bounds = array<i64: 64, 128>}, {pipeline_mode = #tpu.pipeline_mode<synchronous>, transform_indices = @transform_4, window_bounds = array<i64: 2, 128>}, {pipeline_mode = #tpu.pipeline_mode<synchronous>, transform_indices = @transform_5, window_bounds = array<i64: 4, 32>}, {pipeline_mode = #tpu.pipeline_mode<synchronous>, transform_indices = @transform_6, window_bounds = array<i64: 4, 32>}, {pipeline_mode = #tpu.pipeline_mode<synchronous>, transform_indices = @transform_7, window_bounds = array<i64: 16, 32>}, {pipeline_mode = #tpu.pipeline_mode<synchronous>, transform_indices = @transform_8, window_bounds = array<i64: 4, 32>}, {pipeline_mode = #tpu.pipeline_mode<synchronous>, transform_indices = @transform_9, window_bounds = array<i64: 4, 32>}]} {
    %c0 = arith.constant 0 : index
    %c0_0 = arith.constant 0 : index
    %0 = vector.load %arg1[%c0, %c0_0] : memref<16x1xi32, #tpu.memory_space<vmem>>, vector<16x1xi32>
    %1 = tpu.iota {dimensions = array<i32: 1>} : vector<16x16xi32>
    %2 = vector.broadcast %0 : vector<16x1xi32> to vector<16x16xi32>
    %3 = arith.cmpi eq, %2, %1 : vector<16x16xi32>
    %cst = arith.constant 1.000000e+00 : f32
    %cst_1 = arith.constant 0.000000e+00 : f32
    %4 = vector.broadcast %cst : f32 to vector<16x16xf32>
    %5 = vector.broadcast %cst_1 : f32 to vector<16x16xf32>
    %6 = arith.select %3, %4, %5 : vector<16x16xi1>, vector<16x16xf32>
    %c0_2 = arith.constant 0 : index
    %c0_3 = arith.constant 0 : index
    %7 = vector.load %arg2[%c0_2, %c0_3] : memref<16x32xf32, #tpu.memory_space<vmem>>, vector<16x32xf32>
    %cst_4 = arith.constant dense<0.000000e+00> : vector<16x32xf32>
    %8 = tpu.matmul %6, %7, %cst_4 {dimension_numbers = #tpu.dot_dimension_numbers<[1], [0], [0], [1], [0, 0, 1, 1], [], []>} : vector<16x16xf32>, vector<16x32xf32>, vector<16x32xf32> -> vector<16x32xf32>
    %c0_5 = arith.constant 0 : index
    %c0_6 = arith.constant 0 : index
    %9 = vector.load %arg3[%c0_5, %c0_6] : memref<64x128xf32, #tpu.memory_space<vmem>>, vector<32x128xf32>
    %c0_7 = arith.constant 0 : index
    %c0_8 = arith.constant 0 : index
    %10 = vector.load %arg4[%c0_7, %c0_8] : memref<64x128xf32, #tpu.memory_space<vmem>>, vector<32x128xf32>
    %c0_9 = arith.constant 0 : index
    %c0_10 = arith.constant 0 : index
    %11 = vector.load %arg5[%c0_9, %c0_10] : memref<2x128xf32, #tpu.memory_space<vmem>>, vector<1x128xf32>
    %cst_11 = arith.constant dense<0.000000e+00> : vector<16x128xf32>
    %12 = tpu.matmul %8, %9, %cst_11 {dimension_numbers = #tpu.dot_dimension_numbers<[1], [0], [0], [1], [0, 0, 1, 1], [], []>} : vector<16x32xf32>, vector<32x128xf32>, vector<16x128xf32> -> vector<16x128xf32>
    %13 = vector.broadcast %11 : vector<1x128xf32> to vector<16x128xf32>
    %14 = arith.addf %12, %13 : vector<16x128xf32>
    %c0_12 = arith.constant 0 : index
    %c0_13 = arith.constant 0 : index
    %15 = vector.load %arg11[%c0_12, %c0_13] : memref<16x128xf32, #tpu.memory_space<vmem>>, vector<16x128xf32>
    tpu.vector_store %arg11[%c0_12, %c0_13], %14 {strides = array<i32>} : memref<16x128xf32, #tpu.memory_space<vmem>>, vector<16x128xf32>,
    %c0_14 = arith.constant 0 : index
    %c0_15 = arith.constant 0 : index
    %16 = vector.load %arg6[%c0_14, %c0_15] : memref<4x32xf32, #tpu.memory_space<vmem>>, vector<2x32xf32>
    %c0_16 = arith.constant 0 : index
    %c0_17 = arith.constant 0 : index
    %17 = vector.load %arg7[%c0_16, %c0_17] : memref<4x32xf32, #tpu.memory_space<vmem>>, vector<2x32xf32>
    %c0_18 = arith.constant 0 : index
    %c0_19 = arith.constant 0 : index
    %18 = vector.load %arg11[%c0_18, %c0_19] : memref<16x128xf32, #tpu.memory_space<vmem>>, vector<2x128xf32>
    %cst_20 = arith.constant dense<0.000000e+00> : vector<2x128xf32>
    %19 = tpu.matmul %16, %10, %cst_20 {dimension_numbers = #tpu.dot_dimension_numbers<[1], [0], [0], [1], [0, 0, 1, 1], [], []>} : vector<2x32xf32>, vector<32x128xf32>, vector<2x128xf32> -> vector<2x128xf32>
    %20 = arith.addf %18, %19 : vector<2x128xf32>
    %21 = arith.negf %20 : vector<2x128xf32>
    %22 = math.exp %21 : vector<2x128xf32>
    %cst_21 = arith.constant 1.000000e+00 : f32
    %23 = vector.broadcast %cst_21 : f32 to vector<2x128xf32>
    %24 = arith.addf %23, %22 : vector<2x128xf32>
    %25 = arith.divf %23, %24 : vector<2x128xf32>
    %26 = math.tanh %20 : vector<2x128xf32>
    %27 = vector.extract_strided_slice %25 {offsets = [0, 0], sizes = [2, 32], strides = [1, 1]} : vector<2x128xf32> to vector<2x32xf32>
    %28 = vector.extract_strided_slice %25 {offsets = [0, 32], sizes = [2, 32], strides = [1, 1]} : vector<2x128xf32> to vector<2x32xf32>
    %29 = vector.extract_strided_slice %26 {offsets = [0, 64], sizes = [2, 32], strides = [1, 1]} : vector<2x128xf32> to vector<2x32xf32>
    %30 = vector.extract_strided_slice %25 {offsets = [0, 96], sizes = [2, 32], strides = [1, 1]} : vector<2x128xf32> to vector<2x32xf32>
    %31 = arith.mulf %28, %17 : vector<2x32xf32>
    %32 = arith.mulf %27, %29 : vector<2x32xf32>
    %33 = arith.addf %31, %32 : vector<2x32xf32>
    %34 = math.tanh %33 : vector<2x32xf32>
    %35 = arith.mulf %30, %34 : vector<2x32xf32>
    %c0_22 = arith.constant 0 : index
    %c0_23 = arith.constant 0 : index
    %36 = vector.load %arg8[%c0_22, %c0_23] : memref<16x32xf32, #tpu.memory_space<vmem>>, vector<2x32xf32>
    tpu.vector_store %arg8[%c0_22, %c0_23], %35 {strides = array<i32>} : memref<16x32xf32, #tpu.memory_space<vmem>>, vector<2x32xf32>,
    %c2 = arith.constant 2 : index
    %c0_24 = arith.constant 0 : index
    %37 = vector.load %arg11[%c2, %c0_24] : memref<16x128xf32, #tpu.memory_space<vmem>>, vector<2x128xf32>
    %cst_25 = arith.constant dense<0.000000e+00> : vector<2x128xf32>
    %38 = tpu.matmul %35, %10, %cst_25 {dimension_numbers = #tpu.dot_dimension_numbers<[1], [0], [0], [1], [0, 0, 1, 1], [], []>} : vector<2x32xf32>, vector<32x128xf32>, vector<2x128xf32> -> vector<2x128xf32>
    %39 = arith.addf %37, %38 : vector<2x128xf32>
    %40 = arith.negf %39 : vector<2x128xf32>
    %41 = math.exp %40 : vector<2x128xf32>
    %cst_26 = arith.constant 1.000000e+00 : f32
    %42 = vector.broadcast %cst_26 : f32 to vector<2x128xf32>
    %43 = arith.addf %42, %41 : vector<2x128xf32>
    %44 = arith.divf %42, %43 : vector<2x128xf32>
    %45 = math.tanh %39 : vector<2x128xf32>
    %46 = vector.extract_strided_slice %44 {offsets = [0, 0], sizes = [2, 32], strides = [1, 1]} : vector<2x128xf32> to vector<2x32xf32>
    %47 = vector.extract_strided_slice %44 {offsets = [0, 32], sizes = [2, 32], strides = [1, 1]} : vector<2x128xf32> to vector<2x32xf32>
    %48 = vector.extract_strided_slice %45 {offsets = [0, 64], sizes = [2, 32], strides = [1, 1]} : vector<2x128xf32> to vector<2x32xf32>
    %49 = vector.extract_strided_slice %44 {offsets = [0, 96], sizes = [2, 32], strides = [1, 1]} : vector<2x128xf32> to vector<2x32xf32>
    %50 = arith.mulf %47, %33 : vector<2x32xf32>
    %51 = arith.mulf %46, %48 : vector<2x32xf32>
    %52 = arith.addf %50, %51 : vector<2x32xf32>
    %53 = math.tanh %52 : vector<2x32xf32>
    %54 = arith.mulf %49, %53 : vector<2x32xf32>
    %c2_27 = arith.constant 2 : index
    %c0_28 = arith.constant 0 : index
    %55 = vector.load %arg8[%c2_27, %c0_28] : memref<16x32xf32, #tpu.memory_space<vmem>>, vector<2x32xf32>
    tpu.vector_store %arg8[%c2_27, %c0_28], %54 {strides = array<i32>} : memref<16x32xf32, #tpu.memory_space<vmem>>, vector<2x32xf32>,
    %c4 = arith.constant 4 : index
    %c0_29 = arith.constant 0 : index
    %56 = vector.load %arg11[%c4, %c0_29] : memref<16x128xf32, #tpu.memory_space<vmem>>, vector<2x128xf32>
    %cst_30 = arith.constant dense<0.000000e+00> : vector<2x128xf32>
    %57 = tpu.matmul %54, %10, %cst_30 {dimension_numbers = #tpu.dot_dimension_numbers<[1], [0], [0], [1], [0, 0, 1, 1], [], []>} : vector<2x32xf32>, vector<32x128xf32>, vector<2x128xf32> -> vector<2x128xf32>
    %58 = arith.addf %56, %57 : vector<2x128xf32>
    %59 = arith.negf %58 : vector<2x128xf32>
    %60 = math.exp %59 : vector<2x128xf32>
    %cst_31 = arith.constant 1.000000e+00 : f32
    %61 = vector.broadcast %cst_31 : f32 to vector<2x128xf32>
    %62 = arith.addf %61, %60 : vector<2x128xf32>
    %63 = arith.divf %61, %62 : vector<2x128xf32>
    %64 = math.tanh %58 : vector<2x128xf32>
    %65 = vector.extract_strided_slice %63 {offsets = [0, 0], sizes = [2, 32], strides = [1, 1]} : vector<2x128xf32> to vector<2x32xf32>
    %66 = vector.extract_strided_slice %63 {offsets = [0, 32], sizes = [2, 32], strides = [1, 1]} : vector<2x128xf32> to vector<2x32xf32>
    %67 = vector.extract_strided_slice %64 {offsets = [0, 64], sizes = [2, 32], strides = [1, 1]} : vector<2x128xf32> to vector<2x32xf32>
    %68 = vector.extract_strided_slice %63 {offsets = [0, 96], sizes = [2, 32], strides = [1, 1]} : vector<2x128xf32> to vector<2x32xf32>
    %69 = arith.mulf %66, %52 : vector<2x32xf32>
    %70 = arith.mulf %65, %67 : vector<2x32xf32>
    %71 = arith.addf %69, %70 : vector<2x32xf32>
    %72 = math.tanh %71 : vector<2x32xf32>
    %73 = arith.mulf %68, %72 : vector<2x32xf32>
    %c4_32 = arith.constant 4 : index
    %c0_33 = arith.constant 0 : index
    %74 = vector.load %arg8[%c4_32, %c0_33] : memref<16x32xf32, #tpu.memory_space<vmem>>, vector<2x32xf32>
    tpu.vector_store %arg8[%c4_32, %c0_33], %73 {strides = array<i32>} : memref<16x32xf32, #tpu.memory_space<vmem>>, vector<2x32xf32>,
    %c6 = arith.constant 6 : index
    %c0_34 = arith.constant 0 : index
    %75 = vector.load %arg11[%c6, %c0_34] : memref<16x128xf32, #tpu.memory_space<vmem>>, vector<2x128xf32>
    %cst_35 = arith.constant dense<0.000000e+00> : vector<2x128xf32>
    %76 = tpu.matmul %73, %10, %cst_35 {dimension_numbers = #tpu.dot_dimension_numbers<[1], [0], [0], [1], [0, 0, 1, 1], [], []>} : vector<2x32xf32>, vector<32x128xf32>, vector<2x128xf32> -> vector<2x128xf32>
    %77 = arith.addf %75, %76 : vector<2x128xf32>
    %78 = arith.negf %77 : vector<2x128xf32>
    %79 = math.exp %78 : vector<2x128xf32>
    %cst_36 = arith.constant 1.000000e+00 : f32
    %80 = vector.broadcast %cst_36 : f32 to vector<2x128xf32>
    %81 = arith.addf %80, %79 : vector<2x128xf32>
    %82 = arith.divf %80, %81 : vector<2x128xf32>
    %83 = math.tanh %77 : vector<2x128xf32>
    %84 = vector.extract_strided_slice %82 {offsets = [0, 0], sizes = [2, 32], strides = [1, 1]} : vector<2x128xf32> to vector<2x32xf32>
    %85 = vector.extract_strided_slice %82 {offsets = [0, 32], sizes = [2, 32], strides = [1, 1]} : vector<2x128xf32> to vector<2x32xf32>
    %86 = vector.extract_strided_slice %83 {offsets = [0, 64], sizes = [2, 32], strides = [1, 1]} : vector<2x128xf32> to vector<2x32xf32>
    %87 = vector.extract_strided_slice %82 {offsets = [0, 96], sizes = [2, 32], strides = [1, 1]} : vector<2x128xf32> to vector<2x32xf32>
    %88 = arith.mulf %85, %71 : vector<2x32xf32>
    %89 = arith.mulf %84, %86 : vector<2x32xf32>
    %90 = arith.addf %88, %89 : vector<2x32xf32>
    %91 = math.tanh %90 : vector<2x32xf32>
    %92 = arith.mulf %87, %91 : vector<2x32xf32>
    %c6_37 = arith.constant 6 : index
    %c0_38 = arith.constant 0 : index
    %93 = vector.load %arg8[%c6_37, %c0_38] : memref<16x32xf32, #tpu.memory_space<vmem>>, vector<2x32xf32>
    tpu.vector_store %arg8[%c6_37, %c0_38], %92 {strides = array<i32>} : memref<16x32xf32, #tpu.memory_space<vmem>>, vector<2x32xf32>,
    %c8 = arith.constant 8 : index
    %c0_39 = arith.constant 0 : index
    %94 = vector.load %arg11[%c8, %c0_39] : memref<16x128xf32, #tpu.memory_space<vmem>>, vector<2x128xf32>
    %cst_40 = arith.constant dense<0.000000e+00> : vector<2x128xf32>
    %95 = tpu.matmul %92, %10, %cst_40 {dimension_numbers = #tpu.dot_dimension_numbers<[1], [0], [0], [1], [0, 0, 1, 1], [], []>} : vector<2x32xf32>, vector<32x128xf32>, vector<2x128xf32> -> vector<2x128xf32>
    %96 = arith.addf %94, %95 : vector<2x128xf32>
    %97 = arith.negf %96 : vector<2x128xf32>
    %98 = math.exp %97 : vector<2x128xf32>
    %cst_41 = arith.constant 1.000000e+00 : f32
    %99 = vector.broadcast %cst_41 : f32 to vector<2x128xf32>
    %100 = arith.addf %99, %98 : vector<2x128xf32>
    %101 = arith.divf %99, %100 : vector<2x128xf32>
    %102 = math.tanh %96 : vector<2x128xf32>
    %103 = vector.extract_strided_slice %101 {offsets = [0, 0], sizes = [2, 32], strides = [1, 1]} : vector<2x128xf32> to vector<2x32xf32>
    %104 = vector.extract_strided_slice %101 {offsets = [0, 32], sizes = [2, 32], strides = [1, 1]} : vector<2x128xf32> to vector<2x32xf32>
    %105 = vector.extract_strided_slice %102 {offsets = [0, 64], sizes = [2, 32], strides = [1, 1]} : vector<2x128xf32> to vector<2x32xf32>
    %106 = vector.extract_strided_slice %101 {offsets = [0, 96], sizes = [2, 32], strides = [1, 1]} : vector<2x128xf32> to vector<2x32xf32>
    %107 = arith.mulf %104, %90 : vector<2x32xf32>
    %108 = arith.mulf %103, %105 : vector<2x32xf32>
    %109 = arith.addf %107, %108 : vector<2x32xf32>
    %110 = math.tanh %109 : vector<2x32xf32>
    %111 = arith.mulf %106, %110 : vector<2x32xf32>
    %c8_42 = arith.constant 8 : index
    %c0_43 = arith.constant 0 : index
    %112 = vector.load %arg8[%c8_42, %c0_43] : memref<16x32xf32, #tpu.memory_space<vmem>>, vector<2x32xf32>
    tpu.vector_store %arg8[%c8_42, %c0_43], %111 {strides = array<i32>} : memref<16x32xf32, #tpu.memory_space<vmem>>, vector<2x32xf32>,
    %c10 = arith.constant 10 : index
    %c0_44 = arith.constant 0 : index
    %113 = vector.load %arg11[%c10, %c0_44] : memref<16x128xf32, #tpu.memory_space<vmem>>, vector<2x128xf32>
    %cst_45 = arith.constant dense<0.000000e+00> : vector<2x128xf32>
    %114 = tpu.matmul %111, %10, %cst_45 {dimension_numbers = #tpu.dot_dimension_numbers<[1], [0], [0], [1], [0, 0, 1, 1], [], []>} : vector<2x32xf32>, vector<32x128xf32>, vector<2x128xf32> -> vector<2x128xf32>
    %115 = arith.addf %113, %114 : vector<2x128xf32>
    %116 = arith.negf %115 : vector<2x128xf32>
    %117 = math.exp %116 : vector<2x128xf32>
    %cst_46 = arith.constant 1.000000e+00 : f32
    %118 = vector.broadcast %cst_46 : f32 to vector<2x128xf32>
    %119 = arith.addf %118, %117 : vector<2x128xf32>
    %120 = arith.divf %118, %119 : vector<2x128xf32>
    %121 = math.tanh %115 : vector<2x128xf32>
    %122 = vector.extract_strided_slice %120 {offsets = [0, 0], sizes = [2, 32], strides = [1, 1]} : vector<2x128xf32> to vector<2x32xf32>
    %123 = vector.extract_strided_slice %120 {offsets = [0, 32], sizes = [2, 32], strides = [1, 1]} : vector<2x128xf32> to vector<2x32xf32>
    %124 = vector.extract_strided_slice %121 {offsets = [0, 64], sizes = [2, 32], strides = [1, 1]} : vector<2x128xf32> to vector<2x32xf32>
    %125 = vector.extract_strided_slice %120 {offsets = [0, 96], sizes = [2, 32], strides = [1, 1]} : vector<2x128xf32> to vector<2x32xf32>
    %126 = arith.mulf %123, %109 : vector<2x32xf32>
    %127 = arith.mulf %122, %124 : vector<2x32xf32>
    %128 = arith.addf %126, %127 : vector<2x32xf32>
    %129 = math.tanh %128 : vector<2x32xf32>
    %130 = arith.mulf %125, %129 : vector<2x32xf32>
    %c10_47 = arith.constant 10 : index
    %c0_48 = arith.constant 0 : index
    %131 = vector.load %arg8[%c10_47, %c0_48] : memref<16x32xf32, #tpu.memory_space<vmem>>, vector<2x32xf32>
    tpu.vector_store %arg8[%c10_47, %c0_48], %130 {strides = array<i32>} : memref<16x32xf32, #tpu.memory_space<vmem>>, vector<2x32xf32>,
    %c12 = arith.constant 12 : index
    %c0_49 = arith.constant 0 : index
    %132 = vector.load %arg11[%c12, %c0_49] : memref<16x128xf32, #tpu.memory_space<vmem>>, vector<2x128xf32>
    %cst_50 = arith.constant dense<0.000000e+00> : vector<2x128xf32>
    %133 = tpu.matmul %130, %10, %cst_50 {dimension_numbers = #tpu.dot_dimension_numbers<[1], [0], [0], [1], [0, 0, 1, 1], [], []>} : vector<2x32xf32>, vector<32x128xf32>, vector<2x128xf32> -> vector<2x128xf32>
    %134 = arith.addf %132, %133 : vector<2x128xf32>
    %135 = arith.negf %134 : vector<2x128xf32>
    %136 = math.exp %135 : vector<2x128xf32>
    %cst_51 = arith.constant 1.000000e+00 : f32
    %137 = vector.broadcast %cst_51 : f32 to vector<2x128xf32>
    %138 = arith.addf %137, %136 : vector<2x128xf32>
    %139 = arith.divf %137, %138 : vector<2x128xf32>
    %140 = math.tanh %134 : vector<2x128xf32>
    %141 = vector.extract_strided_slice %139 {offsets = [0, 0], sizes = [2, 32], strides = [1, 1]} : vector<2x128xf32> to vector<2x32xf32>
    %142 = vector.extract_strided_slice %139 {offsets = [0, 32], sizes = [2, 32], strides = [1, 1]} : vector<2x128xf32> to vector<2x32xf32>
    %143 = vector.extract_strided_slice %140 {offsets = [0, 64], sizes = [2, 32], strides = [1, 1]} : vector<2x128xf32> to vector<2x32xf32>
    %144 = vector.extract_strided_slice %139 {offsets = [0, 96], sizes = [2, 32], strides = [1, 1]} : vector<2x128xf32> to vector<2x32xf32>
    %145 = arith.mulf %142, %128 : vector<2x32xf32>
    %146 = arith.mulf %141, %143 : vector<2x32xf32>
    %147 = arith.addf %145, %146 : vector<2x32xf32>
    %148 = math.tanh %147 : vector<2x32xf32>
    %149 = arith.mulf %144, %148 : vector<2x32xf32>
    %c12_52 = arith.constant 12 : index
    %c0_53 = arith.constant 0 : index
    %150 = vector.load %arg8[%c12_52, %c0_53] : memref<16x32xf32, #tpu.memory_space<vmem>>, vector<2x32xf32>
    tpu.vector_store %arg8[%c12_52, %c0_53], %149 {strides = array<i32>} : memref<16x32xf32, #tpu.memory_space<vmem>>, vector<2x32xf32>,
    %c14 = arith.constant 14 : index
    %c0_54 = arith.constant 0 : index
    %151 = vector.load %arg11[%c14, %c0_54] : memref<16x128xf32, #tpu.memory_space<vmem>>, vector<2x128xf32>
    %cst_55 = arith.constant dense<0.000000e+00> : vector<2x128xf32>
    %152 = tpu.matmul %149, %10, %cst_55 {dimension_numbers = #tpu.dot_dimension_numbers<[1], [0], [0], [1], [0, 0, 1, 1], [], []>} : vector<2x32xf32>, vector<32x128xf32>, vector<2x128xf32> -> vector<2x128xf32>
    %153 = arith.addf %151, %152 : vector<2x128xf32>
    %154 = arith.negf %153 : vector<2x128xf32>
    %155 = math.exp %154 : vector<2x128xf32>
    %cst_56 = arith.constant 1.000000e+00 : f32
    %156 = vector.broadcast %cst_56 : f32 to vector<2x128xf32>
    %157 = arith.addf %156, %155 : vector<2x128xf32>
    %158 = arith.divf %156, %157 : vector<2x128xf32>
    %159 = math.tanh %153 : vector<2x128xf32>
    %160 = vector.extract_strided_slice %158 {offsets = [0, 0], sizes = [2, 32], strides = [1, 1]} : vector<2x128xf32> to vector<2x32xf32>
    %161 = vector.extract_strided_slice %158 {offsets = [0, 32], sizes = [2, 32], strides = [1, 1]} : vector<2x128xf32> to vector<2x32xf32>
    %162 = vector.extract_strided_slice %159 {offsets = [0, 64], sizes = [2, 32], strides = [1, 1]} : vector<2x128xf32> to vector<2x32xf32>
    %163 = vector.extract_strided_slice %158 {offsets = [0, 96], sizes = [2, 32], strides = [1, 1]} : vector<2x128xf32> to vector<2x32xf32>
    %164 = arith.mulf %161, %147 : vector<2x32xf32>
    %165 = arith.mulf %160, %162 : vector<2x32xf32>
    %166 = arith.addf %164, %165 : vector<2x32xf32>
    %167 = math.tanh %166 : vector<2x32xf32>
    %168 = arith.mulf %163, %167 : vector<2x32xf32>
    %c14_57 = arith.constant 14 : index
    %c0_58 = arith.constant 0 : index
    %169 = vector.load %arg8[%c14_57, %c0_58] : memref<16x32xf32, #tpu.memory_space<vmem>>, vector<2x32xf32>
    tpu.vector_store %arg8[%c14_57, %c0_58], %168 {strides = array<i32>} : memref<16x32xf32, #tpu.memory_space<vmem>>, vector<2x32xf32>,
    %c0_59 = arith.constant 0 : index
    %c0_60 = arith.constant 0 : index
    %170 = vector.load %arg9[%c0_59, %c0_60] : memref<4x32xf32, #tpu.memory_space<vmem>>, vector<2x32xf32>
    tpu.vector_store %arg9[%c0_59, %c0_60], %168 {strides = array<i32>} : memref<4x32xf32, #tpu.memory_space<vmem>>, vector<2x32xf32>,
    %c0_61 = arith.constant 0 : index
    %c0_62 = arith.constant 0 : index
    %171 = vector.load %arg10[%c0_61, %c0_62] : memref<4x32xf32, #tpu.memory_space<vmem>>, vector<2x32xf32>
    tpu.vector_store %arg10[%c0_61, %c0_62], %166 {strides = array<i32>} : memref<4x32xf32, #tpu.memory_space<vmem>>, vector<2x32xf32>,
    %c0_63 = arith.constant 0 : index
    %c0_64 = arith.constant 0 : index
    %172 = vector.load %arg8[%c0_63, %c0_64] : memref<16x32xf32, #tpu.memory_space<vmem>>, vector<16x32xf32>
    %c32 = arith.constant 32 : index
    %c0_65 = arith.constant 0 : index
    %173 = vector.load %arg3[%c32, %c0_65] : memref<64x128xf32, #tpu.memory_space<vmem>>, vector<32x128xf32>
    %c32_66 = arith.constant 32 : index
    %c0_67 = arith.constant 0 : index
    %174 = vector.load %arg4[%c32_66, %c0_67] : memref<64x128xf32, #tpu.memory_space<vmem>>, vector<32x128xf32>
    %c1 = arith.constant 1 : index
    %c0_68 = arith.constant 0 : index
    %175 = vector.load %arg5[%c1, %c0_68] : memref<2x128xf32, #tpu.memory_space<vmem>>, vector<1x128xf32>
    %cst_69 = arith.constant dense<0.000000e+00> : vector<16x128xf32>
    %176 = tpu.matmul %172, %173, %cst_69 {dimension_numbers = #tpu.dot_dimension_numbers<[1], [0], [0], [1], [0, 0, 1, 1], [], []>} : vector<16x32xf32>, vector<32x128xf32>, vector<16x128xf32> -> vector<16x128xf32>
    %177 = vector.broadcast %175 : vector<1x128xf32> to vector<16x128xf32>
    %178 = arith.addf %176, %177 : vector<16x128xf32>
    %c0_70 = arith.constant 0 : index
    %c0_71 = arith.constant 0 : index
    %179 = vector.load %arg11[%c0_70, %c0_71] : memref<16x128xf32, #tpu.memory_space<vmem>>, vector<16x128xf32>
    tpu.vector_store %arg11[%c0_70, %c0_71], %178 {strides = array<i32>} : memref<16x128xf32, #tpu.memory_space<vmem>>, vector<16x128xf32>,
    %c2_72 = arith.constant 2 : index
    %c0_73 = arith.constant 0 : index
    %180 = vector.load %arg6[%c2_72, %c0_73] : memref<4x32xf32, #tpu.memory_space<vmem>>, vector<2x32xf32>
    %c2_74 = arith.constant 2 : index
    %c0_75 = arith.constant 0 : index
    %181 = vector.load %arg7[%c2_74, %c0_75] : memref<4x32xf32, #tpu.memory_space<vmem>>, vector<2x32xf32>
    %c0_76 = arith.constant 0 : index
    %c0_77 = arith.constant 0 : index
    %182 = vector.load %arg11[%c0_76, %c0_77] : memref<16x128xf32, #tpu.memory_space<vmem>>, vector<2x128xf32>
    %cst_78 = arith.constant dense<0.000000e+00> : vector<2x128xf32>
    %183 = tpu.matmul %180, %174, %cst_78 {dimension_numbers = #tpu.dot_dimension_numbers<[1], [0], [0], [1], [0, 0, 1, 1], [], []>} : vector<2x32xf32>, vector<32x128xf32>, vector<2x128xf32> -> vector<2x128xf32>
    %184 = arith.addf %182, %183 : vector<2x128xf32>
    %185 = arith.negf %184 : vector<2x128xf32>
    %186 = math.exp %185 : vector<2x128xf32>
    %cst_79 = arith.constant 1.000000e+00 : f32
    %187 = vector.broadcast %cst_79 : f32 to vector<2x128xf32>
    %188 = arith.addf %187, %186 : vector<2x128xf32>
    %189 = arith.divf %187, %188 : vector<2x128xf32>
    %190 = math.tanh %184 : vector<2x128xf32>
    %191 = vector.extract_strided_slice %189 {offsets = [0, 0], sizes = [2, 32], strides = [1, 1]} : vector<2x128xf32> to vector<2x32xf32>
    %192 = vector.extract_strided_slice %189 {offsets = [0, 32], sizes = [2, 32], strides = [1, 1]} : vector<2x128xf32> to vector<2x32xf32>
    %193 = vector.extract_strided_slice %190 {offsets = [0, 64], sizes = [2, 32], strides = [1, 1]} : vector<2x128xf32> to vector<2x32xf32>
    %194 = vector.extract_strided_slice %189 {offsets = [0, 96], sizes = [2, 32], strides = [1, 1]} : vector<2x128xf32> to vector<2x32xf32>
    %195 = arith.mulf %192, %181 : vector<2x32xf32>
    %196 = arith.mulf %191, %193 : vector<2x32xf32>
    %197 = arith.addf %195, %196 : vector<2x32xf32>
    %198 = math.tanh %197 : vector<2x32xf32>
    %199 = arith.mulf %194, %198 : vector<2x32xf32>
    %c0_80 = arith.constant 0 : index
    %c0_81 = arith.constant 0 : index
    %200 = vector.load %arg8[%c0_80, %c0_81] : memref<16x32xf32, #tpu.memory_space<vmem>>, vector<2x32xf32>
    tpu.vector_store %arg8[%c0_80, %c0_81], %199 {strides = array<i32>} : memref<16x32xf32, #tpu.memory_space<vmem>>, vector<2x32xf32>,
    %c2_82 = arith.constant 2 : index
    %c0_83 = arith.constant 0 : index
    %201 = vector.load %arg11[%c2_82, %c0_83] : memref<16x128xf32, #tpu.memory_space<vmem>>, vector<2x128xf32>
    %cst_84 = arith.constant dense<0.000000e+00> : vector<2x128xf32>
    %202 = tpu.matmul %199, %174, %cst_84 {dimension_numbers = #tpu.dot_dimension_numbers<[1], [0], [0], [1], [0, 0, 1, 1], [], []>} : vector<2x32xf32>, vector<32x128xf32>, vector<2x128xf32> -> vector<2x128xf32>
    %203 = arith.addf %201, %202 : vector<2x128xf32>
    %204 = arith.negf %203 : vector<2x128xf32>
    %205 = math.exp %204 : vector<2x128xf32>
    %cst_85 = arith.constant 1.000000e+00 : f32
    %206 = vector.broadcast %cst_85 : f32 to vector<2x128xf32>
    %207 = arith.addf %206, %205 : vector<2x128xf32>
    %208 = arith.divf %206, %207 : vector<2x128xf32>
    %209 = math.tanh %203 : vector<2x128xf32>
    %210 = vector.extract_strided_slice %208 {offsets = [0, 0], sizes = [2, 32], strides = [1, 1]} : vector<2x128xf32> to vector<2x32xf32>
    %211 = vector.extract_strided_slice %208 {offsets = [0, 32], sizes = [2, 32], strides = [1, 1]} : vector<2x128xf32> to vector<2x32xf32>
    %212 = vector.extract_strided_slice %209 {offsets = [0, 64], sizes = [2, 32], strides = [1, 1]} : vector<2x128xf32> to vector<2x32xf32>
    %213 = vector.extract_strided_slice %208 {offsets = [0, 96], sizes = [2, 32], strides = [1, 1]} : vector<2x128xf32> to vector<2x32xf32>
    %214 = arith.mulf %211, %197 : vector<2x32xf32>
    %215 = arith.mulf %210, %212 : vector<2x32xf32>
    %216 = arith.addf %214, %215 : vector<2x32xf32>
    %217 = math.tanh %216 : vector<2x32xf32>
    %218 = arith.mulf %213, %217 : vector<2x32xf32>
    %c2_86 = arith.constant 2 : index
    %c0_87 = arith.constant 0 : index
    %219 = vector.load %arg8[%c2_86, %c0_87] : memref<16x32xf32, #tpu.memory_space<vmem>>, vector<2x32xf32>
    tpu.vector_store %arg8[%c2_86, %c0_87], %218 {strides = array<i32>} : memref<16x32xf32, #tpu.memory_space<vmem>>, vector<2x32xf32>,
    %c4_88 = arith.constant 4 : index
    %c0_89 = arith.constant 0 : index
    %220 = vector.load %arg11[%c4_88, %c0_89] : memref<16x128xf32, #tpu.memory_space<vmem>>, vector<2x128xf32>
    %cst_90 = arith.constant dense<0.000000e+00> : vector<2x128xf32>
    %221 = tpu.matmul %218, %174, %cst_90 {dimension_numbers = #tpu.dot_dimension_numbers<[1], [0], [0], [1], [0, 0, 1, 1], [], []>} : vector<2x32xf32>, vector<32x128xf32>, vector<2x128xf32> -> vector<2x128xf32>
    %222 = arith.addf %220, %221 : vector<2x128xf32>
    %223 = arith.negf %222 : vector<2x128xf32>
    %224 = math.exp %223 : vector<2x128xf32>
    %cst_91 = arith.constant 1.000000e+00 : f32
    %225 = vector.broadcast %cst_91 : f32 to vector<2x128xf32>
    %226 = arith.addf %225, %224 : vector<2x128xf32>
    %227 = arith.divf %225, %226 : vector<2x128xf32>
    %228 = math.tanh %222 : vector<2x128xf32>
    %229 = vector.extract_strided_slice %227 {offsets = [0, 0], sizes = [2, 32], strides = [1, 1]} : vector<2x128xf32> to vector<2x32xf32>
    %230 = vector.extract_strided_slice %227 {offsets = [0, 32], sizes = [2, 32], strides = [1, 1]} : vector<2x128xf32> to vector<2x32xf32>
    %231 = vector.extract_strided_slice %228 {offsets = [0, 64], sizes = [2, 32], strides = [1, 1]} : vector<2x128xf32> to vector<2x32xf32>
    %232 = vector.extract_strided_slice %227 {offsets = [0, 96], sizes = [2, 32], strides = [1, 1]} : vector<2x128xf32> to vector<2x32xf32>
    %233 = arith.mulf %230, %216 : vector<2x32xf32>
    %234 = arith.mulf %229, %231 : vector<2x32xf32>
    %235 = arith.addf %233, %234 : vector<2x32xf32>
    %236 = math.tanh %235 : vector<2x32xf32>
    %237 = arith.mulf %232, %236 : vector<2x32xf32>
    %c4_92 = arith.constant 4 : index
    %c0_93 = arith.constant 0 : index
    %238 = vector.load %arg8[%c4_92, %c0_93] : memref<16x32xf32, #tpu.memory_space<vmem>>, vector<2x32xf32>
    tpu.vector_store %arg8[%c4_92, %c0_93], %237 {strides = array<i32>} : memref<16x32xf32, #tpu.memory_space<vmem>>, vector<2x32xf32>,
    %c6_94 = arith.constant 6 : index
    %c0_95 = arith.constant 0 : index
    %239 = vector.load %arg11[%c6_94, %c0_95] : memref<16x128xf32, #tpu.memory_space<vmem>>, vector<2x128xf32>
    %cst_96 = arith.constant dense<0.000000e+00> : vector<2x128xf32>
    %240 = tpu.matmul %237, %174, %cst_96 {dimension_numbers = #tpu.dot_dimension_numbers<[1], [0], [0], [1], [0, 0, 1, 1], [], []>} : vector<2x32xf32>, vector<32x128xf32>, vector<2x128xf32> -> vector<2x128xf32>
    %241 = arith.addf %239, %240 : vector<2x128xf32>
    %242 = arith.negf %241 : vector<2x128xf32>
    %243 = math.exp %242 : vector<2x128xf32>
    %cst_97 = arith.constant 1.000000e+00 : f32
    %244 = vector.broadcast %cst_97 : f32 to vector<2x128xf32>
    %245 = arith.addf %244, %243 : vector<2x128xf32>
    %246 = arith.divf %244, %245 : vector<2x128xf32>
    %247 = math.tanh %241 : vector<2x128xf32>
    %248 = vector.extract_strided_slice %246 {offsets = [0, 0], sizes = [2, 32], strides = [1, 1]} : vector<2x128xf32> to vector<2x32xf32>
    %249 = vector.extract_strided_slice %246 {offsets = [0, 32], sizes = [2, 32], strides = [1, 1]} : vector<2x128xf32> to vector<2x32xf32>
    %250 = vector.extract_strided_slice %247 {offsets = [0, 64], sizes = [2, 32], strides = [1, 1]} : vector<2x128xf32> to vector<2x32xf32>
    %251 = vector.extract_strided_slice %246 {offsets = [0, 96], sizes = [2, 32], strides = [1, 1]} : vector<2x128xf32> to vector<2x32xf32>
    %252 = arith.mulf %249, %235 : vector<2x32xf32>
    %253 = arith.mulf %248, %250 : vector<2x32xf32>
    %254 = arith.addf %252, %253 : vector<2x32xf32>
    %255 = math.tanh %254 : vector<2x32xf32>
    %256 = arith.mulf %251, %255 : vector<2x32xf32>
    %c6_98 = arith.constant 6 : index
    %c0_99 = arith.constant 0 : index
    %257 = vector.load %arg8[%c6_98, %c0_99] : memref<16x32xf32, #tpu.memory_space<vmem>>, vector<2x32xf32>
    tpu.vector_store %arg8[%c6_98, %c0_99], %256 {strides = array<i32>} : memref<16x32xf32, #tpu.memory_space<vmem>>, vector<2x32xf32>,
    %c8_100 = arith.constant 8 : index
    %c0_101 = arith.constant 0 : index
    %258 = vector.load %arg11[%c8_100, %c0_101] : memref<16x128xf32, #tpu.memory_space<vmem>>, vector<2x128xf32>
    %cst_102 = arith.constant dense<0.000000e+00> : vector<2x128xf32>
    %259 = tpu.matmul %256, %174, %cst_102 {dimension_numbers = #tpu.dot_dimension_numbers<[1], [0], [0], [1], [0, 0, 1, 1], [], []>} : vector<2x32xf32>, vector<32x128xf32>, vector<2x128xf32> -> vector<2x128xf32>
    %260 = arith.addf %258, %259 : vector<2x128xf32>
    %261 = arith.negf %260 : vector<2x128xf32>
    %262 = math.exp %261 : vector<2x128xf32>
    %cst_103 = arith.constant 1.000000e+00 : f32
    %263 = vector.broadcast %cst_103 : f32 to vector<2x128xf32>
    %264 = arith.addf %263, %262 : vector<2x128xf32>
    %265 = arith.divf %263, %264 : vector<2x128xf32>
    %266 = math.tanh %260 : vector<2x128xf32>
    %267 = vector.extract_strided_slice %265 {offsets = [0, 0], sizes = [2, 32], strides = [1, 1]} : vector<2x128xf32> to vector<2x32xf32>
    %268 = vector.extract_strided_slice %265 {offsets = [0, 32], sizes = [2, 32], strides = [1, 1]} : vector<2x128xf32> to vector<2x32xf32>
    %269 = vector.extract_strided_slice %266 {offsets = [0, 64], sizes = [2, 32], strides = [1, 1]} : vector<2x128xf32> to vector<2x32xf32>
    %270 = vector.extract_strided_slice %265 {offsets = [0, 96], sizes = [2, 32], strides = [1, 1]} : vector<2x128xf32> to vector<2x32xf32>
    %271 = arith.mulf %268, %254 : vector<2x32xf32>
    %272 = arith.mulf %267, %269 : vector<2x32xf32>
    %273 = arith.addf %271, %272 : vector<2x32xf32>
    %274 = math.tanh %273 : vector<2x32xf32>
    %275 = arith.mulf %270, %274 : vector<2x32xf32>
    %c8_104 = arith.constant 8 : index
    %c0_105 = arith.constant 0 : index
    %276 = vector.load %arg8[%c8_104, %c0_105] : memref<16x32xf32, #tpu.memory_space<vmem>>, vector<2x32xf32>
    tpu.vector_store %arg8[%c8_104, %c0_105], %275 {strides = array<i32>} : memref<16x32xf32, #tpu.memory_space<vmem>>, vector<2x32xf32>,
    %c10_106 = arith.constant 10 : index
    %c0_107 = arith.constant 0 : index
    %277 = vector.load %arg11[%c10_106, %c0_107] : memref<16x128xf32, #tpu.memory_space<vmem>>, vector<2x128xf32>
    %cst_108 = arith.constant dense<0.000000e+00> : vector<2x128xf32>
    %278 = tpu.matmul %275, %174, %cst_108 {dimension_numbers = #tpu.dot_dimension_numbers<[1], [0], [0], [1], [0, 0, 1, 1], [], []>} : vector<2x32xf32>, vector<32x128xf32>, vector<2x128xf32> -> vector<2x128xf32>
    %279 = arith.addf %277, %278 : vector<2x128xf32>
    %280 = arith.negf %279 : vector<2x128xf32>
    %281 = math.exp %280 : vector<2x128xf32>
    %cst_109 = arith.constant 1.000000e+00 : f32
    %282 = vector.broadcast %cst_109 : f32 to vector<2x128xf32>
    %283 = arith.addf %282, %281 : vector<2x128xf32>
    %284 = arith.divf %282, %283 : vector<2x128xf32>
    %285 = math.tanh %279 : vector<2x128xf32>
    %286 = vector.extract_strided_slice %284 {offsets = [0, 0], sizes = [2, 32], strides = [1, 1]} : vector<2x128xf32> to vector<2x32xf32>
    %287 = vector.extract_strided_slice %284 {offsets = [0, 32], sizes = [2, 32], strides = [1, 1]} : vector<2x128xf32> to vector<2x32xf32>
    %288 = vector.extract_strided_slice %285 {offsets = [0, 64], sizes = [2, 32], strides = [1, 1]} : vector<2x128xf32> to vector<2x32xf32>
    %289 = vector.extract_strided_slice %284 {offsets = [0, 96], sizes = [2, 32], strides = [1, 1]} : vector<2x128xf32> to vector<2x32xf32>
    %290 = arith.mulf %287, %273 : vector<2x32xf32>
    %291 = arith.mulf %286, %288 : vector<2x32xf32>
    %292 = arith.addf %290, %291 : vector<2x32xf32>
    %293 = math.tanh %292 : vector<2x32xf32>
    %294 = arith.mulf %289, %293 : vector<2x32xf32>
    %c10_110 = arith.constant 10 : index
    %c0_111 = arith.constant 0 : index
    %295 = vector.load %arg8[%c10_110, %c0_111] : memref<16x32xf32, #tpu.memory_space<vmem>>, vector<2x32xf32>
    tpu.vector_store %arg8[%c10_110, %c0_111], %294 {strides = array<i32>} : memref<16x32xf32, #tpu.memory_space<vmem>>, vector<2x32xf32>,
    %c12_112 = arith.constant 12 : index
    %c0_113 = arith.constant 0 : index
    %296 = vector.load %arg11[%c12_112, %c0_113] : memref<16x128xf32, #tpu.memory_space<vmem>>, vector<2x128xf32>
    %cst_114 = arith.constant dense<0.000000e+00> : vector<2x128xf32>
    %297 = tpu.matmul %294, %174, %cst_114 {dimension_numbers = #tpu.dot_dimension_numbers<[1], [0], [0], [1], [0, 0, 1, 1], [], []>} : vector<2x32xf32>, vector<32x128xf32>, vector<2x128xf32> -> vector<2x128xf32>
    %298 = arith.addf %296, %297 : vector<2x128xf32>
    %299 = arith.negf %298 : vector<2x128xf32>
    %300 = math.exp %299 : vector<2x128xf32>
    %cst_115 = arith.constant 1.000000e+00 : f32
    %301 = vector.broadcast %cst_115 : f32 to vector<2x128xf32>
    %302 = arith.addf %301, %300 : vector<2x128xf32>
    %303 = arith.divf %301, %302 : vector<2x128xf32>
    %304 = math.tanh %298 : vector<2x128xf32>
    %305 = vector.extract_strided_slice %303 {offsets = [0, 0], sizes = [2, 32], strides = [1, 1]} : vector<2x128xf32> to vector<2x32xf32>
    %306 = vector.extract_strided_slice %303 {offsets = [0, 32], sizes = [2, 32], strides = [1, 1]} : vector<2x128xf32> to vector<2x32xf32>
    %307 = vector.extract_strided_slice %304 {offsets = [0, 64], sizes = [2, 32], strides = [1, 1]} : vector<2x128xf32> to vector<2x32xf32>
    %308 = vector.extract_strided_slice %303 {offsets = [0, 96], sizes = [2, 32], strides = [1, 1]} : vector<2x128xf32> to vector<2x32xf32>
    %309 = arith.mulf %306, %292 : vector<2x32xf32>
    %310 = arith.mulf %305, %307 : vector<2x32xf32>
    %311 = arith.addf %309, %310 : vector<2x32xf32>
    %312 = math.tanh %311 : vector<2x32xf32>
    %313 = arith.mulf %308, %312 : vector<2x32xf32>
    %c12_116 = arith.constant 12 : index
    %c0_117 = arith.constant 0 : index
    %314 = vector.load %arg8[%c12_116, %c0_117] : memref<16x32xf32, #tpu.memory_space<vmem>>, vector<2x32xf32>
    tpu.vector_store %arg8[%c12_116, %c0_117], %313 {strides = array<i32>} : memref<16x32xf32, #tpu.memory_space<vmem>>, vector<2x32xf32>,
    %c14_118 = arith.constant 14 : index
    %c0_119 = arith.constant 0 : index
    %315 = vector.load %arg11[%c14_118, %c0_119] : memref<16x128xf32, #tpu.memory_space<vmem>>, vector<2x128xf32>
    %cst_120 = arith.constant dense<0.000000e+00> : vector<2x128xf32>
    %316 = tpu.matmul %313, %174, %cst_120 {dimension_numbers = #tpu.dot_dimension_numbers<[1], [0], [0], [1], [0, 0, 1, 1], [], []>} : vector<2x32xf32>, vector<32x128xf32>, vector<2x128xf32> -> vector<2x128xf32>
    %317 = arith.addf %315, %316 : vector<2x128xf32>
    %318 = arith.negf %317 : vector<2x128xf32>
    %319 = math.exp %318 : vector<2x128xf32>
    %cst_121 = arith.constant 1.000000e+00 : f32
    %320 = vector.broadcast %cst_121 : f32 to vector<2x128xf32>
    %321 = arith.addf %320, %319 : vector<2x128xf32>
    %322 = arith.divf %320, %321 : vector<2x128xf32>
    %323 = math.tanh %317 : vector<2x128xf32>
    %324 = vector.extract_strided_slice %322 {offsets = [0, 0], sizes = [2, 32], strides = [1, 1]} : vector<2x128xf32> to vector<2x32xf32>
    %325 = vector.extract_strided_slice %322 {offsets = [0, 32], sizes = [2, 32], strides = [1, 1]} : vector<2x128xf32> to vector<2x32xf32>
    %326 = vector.extract_strided_slice %323 {offsets = [0, 64], sizes = [2, 32], strides = [1, 1]} : vector<2x128xf32> to vector<2x32xf32>
    %327 = vector.extract_strided_slice %322 {offsets = [0, 96], sizes = [2, 32], strides = [1, 1]} : vector<2x128xf32> to vector<2x32xf32>
    %328 = arith.mulf %325, %311 : vector<2x32xf32>
    %329 = arith.mulf %324, %326 : vector<2x32xf32>
    %330 = arith.addf %328, %329 : vector<2x32xf32>
    %331 = math.tanh %330 : vector<2x32xf32>
    %332 = arith.mulf %327, %331 : vector<2x32xf32>
    %c14_122 = arith.constant 14 : index
    %c0_123 = arith.constant 0 : index
    %333 = vector.load %arg8[%c14_122, %c0_123] : memref<16x32xf32, #tpu.memory_space<vmem>>, vector<2x32xf32>
    tpu.vector_store %arg8[%c14_122, %c0_123], %332 {strides = array<i32>} : memref<16x32xf32, #tpu.memory_space<vmem>>, vector<2x32xf32>,
    %c2_124 = arith.constant 2 : index
    %c0_125 = arith.constant 0 : index
    %334 = vector.load %arg9[%c2_124, %c0_125] : memref<4x32xf32, #tpu.memory_space<vmem>>, vector<2x32xf32>
    tpu.vector_store %arg9[%c2_124, %c0_125], %332 {strides = array<i32>} : memref<4x32xf32, #tpu.memory_space<vmem>>, vector<2x32xf32>,
    %c2_126 = arith.constant 2 : index
    %c0_127 = arith.constant 0 : index
    %335 = vector.load %arg10[%c2_126, %c0_127] : memref<4x32xf32, #tpu.memory_space<vmem>>, vector<2x32xf32>
    tpu.vector_store %arg10[%c2_126, %c0_127], %330 {strides = array<i32>} : memref<4x32xf32, #tpu.memory_space<vmem>>, vector<2x32xf32>,
    return
  }
  func.func @transform_0(%arg0: i32) -> (i32, i32) {
    %c0_i32 = arith.constant 0 : i32
    %c0_i32_0 = arith.constant 0 : i32
    %c0_i32_1 = arith.constant 0 : i32
    return %c0_i32, %c0_i32_0 : i32, i32
  }
  func.func @transform_1(%arg0: i32) -> (i32, i32) {
    %c0_i32 = arith.constant 0 : i32
    %c0_i32_0 = arith.constant 0 : i32
    %c0_i32_1 = arith.constant 0 : i32
    return %c0_i32, %c0_i32_0 : i32, i32
  }
  func.func @transform_2(%arg0: i32) -> (i32, i32) {
    %c0_i32 = arith.constant 0 : i32
    %c0_i32_0 = arith.constant 0 : i32
    %c0_i32_1 = arith.constant 0 : i32
    return %c0_i32, %c0_i32_0 : i32, i32
  }
  func.func @transform_3(%arg0: i32) -> (i32, i32) {
    %c0_i32 = arith.constant 0 : i32
    %c0_i32_0 = arith.constant 0 : i32
    %c0_i32_1 = arith.constant 0 : i32
    return %c0_i32, %c0_i32_0 : i32, i32
  }
  func.func @transform_4(%arg0: i32) -> (i32, i32) {
    %c0_i32 = arith.constant 0 : i32
    %c0_i32_0 = arith.constant 0 : i32
    %c0_i32_1 = arith.constant 0 : i32
    return %c0_i32, %c0_i32_0 : i32, i32
  }
  func.func @transform_5(%arg0: i32) -> (i32, i32) {
    %c0_i32 = arith.constant 0 : i32
    %c0_i32_0 = arith.constant 0 : i32
    %c0_i32_1 = arith.constant 0 : i32
    return %c0_i32, %c0_i32_0 : i32, i32
  }
  func.func @transform_6(%arg0: i32) -> (i32, i32) {
    %c0_i32 = arith.constant 0 : i32
    %c0_i32_0 = arith.constant 0 : i32
    %c0_i32_1 = arith.constant 0 : i32
    return %c0_i32, %c0_i32_0 : i32, i32
  }
  func.func @transform_7(%arg0: i32) -> (i32, i32) {
    %c0_i32 = arith.constant 0 : i32
    %c0_i32_0 = arith.constant 0 : i32
    %c0_i32_1 = arith.constant 0 : i32
    return %c0_i32, %c0_i32_0 : i32, i32
  }
  func.func @transform_8(%arg0: i32) -> (i32, i32) {
    %c0_i32 = arith.constant 0 : i32
    %c0_i32_0 = arith.constant 0 : i32
    %c0_i32_1 = arith.constant 0 : i32
    return %c0_i32, %c0_i32_0 : i32, i32
  }
  func.func @transform_9(%arg0: i32) -> (i32, i32) {
    %c0_i32 = arith.constant 0 : i32
    %c0_i32_0 = arith.constant 0 : i32
    %c0_i32_1 = arith.constant 0 : i32
    return %c0_i32, %c0_i32_0 : i32, i32
  }
}

</mosaic_0001>

<bundles_post_ra>
// kernel: prediction_forward.1
= control target key start
LH: loop header
LB: loop body
LE: loop exit
PB: predicated region body
PF: predicated region fallthrough
CT: control target
= control target key end

     0   :  { %15 = vsyncpa [#allocation4], 0  ;;  %s3249_s0 = inlined_call_operand.vmem [shape: s32[16,1], index: 0, kind: input, shape index: {}]   ;;  %s3250_s1 = inlined_call_operand.hbm [shape: f32[16,32], index: 1, kind: input, shape index: {}]   ;;  %s3251_s2 = inlined_call_operand.vmem [shape: f32[64,128], index: 2, kind: input, shape index: {}]   ;;  %s3252_s3 = inlined_call_operand.hbm [shape: f32[64,128], index: 3, kind: input, shape index: {}]   ;;  %s3253_s4 = inlined_call_operand.vmem [shape: f32[2,128], index: 4, kind: input, shape index: {}]   ;;  %s3254_s5 = inlined_call_operand.vmem [shape: f32[4,32], index: 5, kind: input, shape index: {}]   ;;  %s3255_s6 = inlined_call_operand.hbm [shape: f32[4,32], index: 6, kind: input, shape index: {}]   ;;  %s3256_s7 = inlined_call_operand.hbm [shape: f32[16,32], index: 7, kind: output, shape index: {0}]   ;;  %s3257_s8 = inlined_call_operand.hbm [shape: f32[4,32], index: 8, kind: output, shape index: {1}]   ;;  %s3258_s9 = inlined_call_operand.hbm [shape: f32[4,32], index: 9, kind: output, shape index: {2}]  }
   0x1   :  { %16 = vsyncpa [#allocation7], 0 }
   0x2   :  { %17 = vsyncpa [#allocation5], 0 }
   0x3   :  { %18 = vsyncpa [#allocation11], 0  ;;  %s2824_s30 = smov [#allocation6]   ;;  %s2825_s11 = smov [#allocation3]  }
   0x4   :  { %s40_s10 = sshll.u32 %s2824_s30, 4  ;;  %s26_s12 = sshll.u32 %s2825_s11, 4  ;;  %s41_s10 = int_to_ptr.vmem [resolvable:$true] %s40_s10  ;;  %s2889_s12 = int_to_ptr.vmem [resolvable:$true] %s26_s12 }
   0x5   :  { %s2684_s15 = scalar_lea.hbm %s3252_s3, 1024 }
   0x6   :  { %p2685_p0 = scmp.ne.s32.totalorder %s3252_s3, %s2684_s15  ;;  %p2688_p1 = scmp.lt.u32.totalorder %s2684_s15, %s3252_s3 }
   0x8   :  { %p2690_p2 = pnand %p2688_p1, %p2685_p0 }
   0xa   :  { %2693 = shalt.err (!%p2690_p2)
}
   0xb   :  { %s2694_s20 = scalar_lea.vmem %s41_s10, 1024  ;;  %p2699_p4 = scmp.lt.s32.totalorder %s41_s10, %s41_s10 }
   0xc   :  { %p2695_p3 = scmp.ne.s32.totalorder %s41_s10, %s2694_s20  ;;  %p2700_p5 = scmp.lt.s32.totalorder %s2694_s20, %s2694_s20 }
   0xe   :  { %p2701_p6 = por %p2700_p5, %p2699_p4 }
  0x10   :  { %p2702_p7 = pnand %p2701_p6, %p2695_p3 }
  0x12   :  { %2705 = shalt.err (!%p2702_p7)
}
  0x13   :  { %s2826_s21 = smov 128   ;;  %s2827_s22 = smov 8  }
  0x14   :  { %46 = dma.hbm_to_vmem [thread:$0]  %s3252_s3, 1024, %s41_s10, [#allocation7], %s2826_s21, %s2826_s21, %s2827_s22  }
  0x15   :  { %s2706_s27 = scalar_lea.hbm %s3250_s1, 256 }
  0x16   :  { %p2707_p8 = scmp.ne.s32.totalorder %s3250_s1, %s2706_s27  ;;  %p2710_p9 = scmp.lt.u32.totalorder %s2706_s27, %s3250_s1 }
  0x18   :  { %p2712_p10 = pnand %p2710_p9, %p2707_p8 }
  0x1a   :  { %2715 = shalt.err (!%p2712_p10)
}
  0x1b   :  { %s2716_s13 = scalar_lea.vmem %s2889_s12, 256  ;;  %p2721_p12 = scmp.lt.s32.totalorder %s2889_s12, %s2889_s12 }
  0x1c   :  { %p2717_p11 = scmp.ne.s32.totalorder %s2889_s12, %s2716_s13  ;;  %p2722_p13 = scmp.lt.s32.totalorder %s2716_s13, %s2716_s13 }
  0x1e   :  { %p2723_p0 = por %p2722_p13, %p2721_p12 }
  0x20   :  { %p2724_p1 = pnand %p2723_p0, %p2717_p11 }
  0x22   :  { %2727 = shalt.err (!%p2724_p1)
}
  0x23   :  { %32 = dma.hbm_to_vmem [thread:$0]  %s3250_s1, 256, %s2889_s12, [#allocation4], %s2826_s21, %s2826_s21, %s2827_s22  }
  0x24   :  { %s2828_s14 = smov [#allocation8]   ;;  %s2728_s18 = scalar_lea.hbm %s3255_s6, 64 }
  0x25   :  { %s57_s15 = sshll.u32 %s2828_s14, 4  ;;  %p2729_p2 = scmp.ne.s32.totalorder %s3255_s6, %s2728_s18  ;;  %s58_s15 = int_to_ptr.vmem [resolvable:$true] %s57_s15 }
  0x26   :  { %p2732_p3 = scmp.lt.u32.totalorder %s2728_s18, %s3255_s6 }
  0x28   :  { %p2734_p4 = pnand %p2732_p3, %p2729_p2 }
  0x2a   :  { %2737 = shalt.err (!%p2734_p4)
}
  0x2b   :  { %s2738_s25 = scalar_lea.vmem %s58_s15, 64  ;;  %p2743_p6 = scmp.lt.s32.totalorder %s58_s15, %s58_s15 }
  0x2c   :  { %p2739_p5 = scmp.ne.s32.totalorder %s58_s15, %s2738_s25  ;;  %p2744_p7 = scmp.lt.s32.totalorder %s2738_s25, %s2738_s25 }
  0x2e   :  { %p2745_p8 = por %p2744_p7, %p2743_p6 }
  0x30   :  { %p2746_p9 = pnand %p2745_p8, %p2739_p5 }
  0x32   :  { %2749 = shalt.err (!%p2746_p9)
}
  0x33   :  { %60 = dma.hbm_to_vmem [thread:$0]  %s3255_s6, 64, %s58_s15, [#allocation7]  }
  0x34   :  { %2816 = dma.done.wait [#allocation4], 256  }
  0x35   :  { %2817 = vsyncadd [#allocation4], 4294967040 }
  0x36   :  { %2818 = dma.done.wait [#allocation7], 1088  }
  0x37   :  { %2819 = vsyncadd [#allocation7], 4294966208  ;;  %v2829_v0 = vmov 0   ;;  %v70_v1 = vld [vmem:[%s3249_s0] sm:$0xff]  ;;  %v84_v2 = vld [vmem:[#allocation3] sm:$0xff]  ;;  %v72_v12 = vlaneseq  ;;  %vm86_vm0 = vcmask 130048  }
  0x38   :  { %2555 = vset.pattern.permute.xlu0 %v2829_v0  ;;  %v85_v3 = vld [vmem:[#allocation3 + $0x8] sm:$0xff]  ;;  %v71_v4 = vld [vmem:[%s3249_s0 + $0x8] sm:$0xff]  ;;  %v168_v6 = vld [vmem:[%s3251_s2] sm:$0xff]  ;;  %v2830_v15 = vmov 0.0   ;;  %v2831_v22 = vmov 0.0|0.0   ;;  %vm2832_vm3 = vmmov 0  }
  0x39   :  { %75 = vperm.xlu0 %2555, %v70_v1   ;;  %v2424_v5 = vpack.c.bf16 %v85_v3, %v84_v2  ;;  %v169_v7 = vld [vmem:[%s3251_s2 + $0x8] sm:$0xff]  ;;  %v170_v8 = vld [vmem:[%s3251_s2 + $0x10] sm:$0xff]  ;;  %v171_v10 = vld [vmem:[%s3251_s2 + $0x18] sm:$0xff]  ;;  %v73_v13 = vand.u32 127, %v72_v12  ;;  %vm181_vm4 = vcmask 261120   ;;  %s2833_s19 = smov 64  }
  0x3a   :  { %v2428_v9 = vpack.c.bf16 %v169_v7, %v168_v6  ;;  %v2432_v11 = vpack.c.bf16 %v171_v10, %v170_v8  ;;  %v172_v19 = vld [vmem:[#allocation6] sm:$0xff]  ;;  %v173_v20 = vld [vmem:[#allocation6 + $0x8] sm:$0xff]  ;;  %v174_v21 = vld [vmem:[#allocation6 + $0x10] sm:$0xff]  ;;  %s2834_s20 = smov 32   ;;  %vm374_vm5 = vcmask 254976   ;;  %s2836_s30 = smov [#allocation10]  }
  0x3b   :  { %2425 = vmatprep.subr.bf16.mxu0 %v2424_v5  ;;  %v2959_v23 = vpack.c.bf16 %v173_v20, %v172_v19  ;;  %v175_v24 = vld [vmem:[#allocation6 + $0x18] sm:$0xff]  ;;  %v265_v26 = vld [vmem:[%s3254_s5] sm:$0x3]  ;;  %s2056_s11 = sshll.u32 %s2836_s30, 4  ;;  %s2837_s13 = smov [#allocation9]   ;;  %s2057_s11 = int_to_ptr.vmem [resolvable:$true] %s2056_s11 }
  0x3c   :  { %2427 = vmatpush3.bf16.msra.mxu0 %v2424_v5  ;;  %2429 = vmatprep.subr.bf16.mxu1 %v2428_v9  ;;  %v2965_v25 = vpack.c.bf16 %v175_v24, %v174_v21  ;;  %v2085_v31 = vld [vmem:[%s3253_s4] ss:$0 sm:$0xff]  ;;  %s2043_s3 = sshll.u32 %s2837_s13, 4  ;;  %s2838_s10 = smov [#allocation12]   ;;  %s3193_s3 = int_to_ptr.vmem [resolvable:$true] %s2043_s3 }
  0x3d   :  { %78 = vperm.xlu0 %2555, %v71_v4   ;;  %2431 = vmatpush3.bf16.msra.mxu1 %v2428_v9  ;;  %v266_v39 = vld [vmem:[#allocation8] sm:$0x3]  ;;  %s2066_s14 = sshll.u32 %s2838_s10, 4  ;;  %s2750_s15 = scalar_lea.vmem %s2057_s11, 64  ;;  %s3197_s14 = int_to_ptr.vmem [resolvable:$true] %s2066_s14 }
  0x3e   :  { %2433 = vmatprep.subr.bf16.mxu1 %v2432_v11  ;;  %2436 = vmatprep.subr.bf16.mxu0 %v2831_v22  ;;  %p2751_p10 = scmp.ne.s32.totalorder %s2057_s11, %s2750_s15  ;;  %p2755_p11 = scmp.lt.s32.totalorder %s2057_s11, %s2057_s11 }
  0x3f   :  { %p2756_p12 = scmp.lt.s32.totalorder %s2750_s15, %s2750_s15 }
  0x41   :  { %2435 = vmatpush3.bf16.msra.mxu1 %v2432_v11  ;;  %p2757_p13 = por %p2756_p12, %p2755_p11 }
  0x42   :  { %2442 = vmatprep.subr.bf16.mxu1 %v2831_v22 }
  0x43   :  { %p2758_p0 = pnand %p2757_p13, %p2751_p10 }
  0xb8   :  { %v76_v14 = vpop.permute.xlu0 %75 }
  0xb9   :  { %vm80_vm1 = vcmp.eq.s32.totalorder %v76_v14, %v73_v13 }
  0xba   :  { %v82_v16 = vsel %vm80_vm1, 1.0, %v2830_v15 }
  0xbb   :  { %2223 = vmatprep.mubr.msk.f32.mxu0 %vm86_vm0, %v82_v16 }
  0xbc   :  { %v79_v17 = vpop.permute.xlu0 %78 }
  0xbd   :  { %vm81_vm2 = vcmp.eq.s32.totalorder %v79_v17, %v73_v13 }
  0xbe   :  { %v83_v18 = vsel %vm81_vm2, 1.0, %v2830_v15 }
  0xbf   :  { %2224 = vmatmul.mubr.msk.f32.vlgmr.msra.gmra.mrb[0].mxu0 %vm86_vm0, %v83_v18 }
  0xc0   :  { %2245 = vmatprep.mubr.msk.f32.mxu0 %vm2832_vm3, %v2830_v15  ;;  %2438 = vmatpush3.bf16.msra.mxu0 %v2959_v23 }
  0xc1   :  { %2439 = vmatprep.subr.bf16.mxu0 %v2831_v22 }
  0xc4   :  { %2441 = vmatpush3.bf16.msra.mxu0 %v2965_v25 }
  0xc5   :  { %2448 = vmatprep.subr.bf16.mxu0 %v2831_v22 }
  0xc7   :  { %2246 = vmatmul.mubr.msk.f32.vlgmr.msra.gmra.mrb[2].mxu0 %vm181_vm4, %v265_v26 }
  0xc8   :  { %2450 = vmatpush3.bf16.msra.mxu0 %v2959_v23  ;;  %2267 = vmatprep.mubr.msk.f32.mxu0 %vm2832_vm3, %v2830_v15 }
  0xc9   :  { %2451 = vmatprep.subr.bf16.mxu0 %v2831_v22 }
  0xcc   :  { %2453 = vmatpush3.bf16.msra.mxu0 %v2965_v25 }
  0xcd   :  { %2460 = vmatprep.subr.bf16.mxu0 %v2831_v22 }
 0x192   :  { %v2225_v27 = vpop.f32.mrb[0].mxu0 }
 0x193   :  { %v159_v28 = vpop.f32.mrb[1].mxu0 }
 0x194   :  { %2234 = vmatprep.mubr.msk.f32.mxu1 %vm181_vm4, %v159_v28 }
 0x195   :  { %2235 = vmatmul.mubr.msk.f32.vlgmr.msra.gmra.mrb[0].mxu1 %vm181_vm4, %v2225_v27 }
 0x196   :  { %2444 = vmatpush3.bf16.msra.mxu1 %v2959_v23  ;;  %2256 = vmatprep.mubr.msk.f32.mxu1 %vm2832_vm3, %v2830_v15 }
 0x197   :  { %2445 = vmatprep.subr.bf16.mxu1 %v2831_v22 }
 0x19a   :  { %2447 = vmatpush3.bf16.msra.mxu1 %v2965_v25  ;;  %v337_v29 = vpop.f32.mrb[2].mxu0 }
 0x19b   :  { %2454 = vmatprep.subr.bf16.mxu1 %v2831_v22  ;;  %v2247_v30 = vpop.f32.mrb[3].mxu0 }
 0x268   :  { %v2236_v32 = vpop.f32.mrb[0].mxu1 }
 0x269   :  { %v260_v33 = vadd.f32 %v2236_v32, %v2085_v31  ;;  %v254_v34 = vpop.f32.mrb[1].mxu1 }
 0x26a   :  { %v255_v35 = vadd.f32 %v2085_v31, %v254_v34 }
 0x26b   :  { %264 = vst [vmem:[#allocation2 + $0x8] sm:$0xff] %v260_v33 }
 0x26c   :  { %263 = vst [vmem:[#allocation2] sm:$0xff] %v255_v35 }
 0x273   :  { %v267_v36 = vld [vmem:[#allocation2] sm:$0x3]  ;;  %v376_v54 = vld [vmem:[#allocation2 + $0x2] sm:$0x3]  ;;  %v479_v8 = vld [vmem:[#allocation2 + $0x4] sm:$0x3] }
 0x274   :  { %v341_v37 = vadd.f32 %v337_v29, %v267_v36  ;;  %v582_v30 = vld [vmem:[#allocation2 + $0x6] sm:$0x3] }
 0x276   :  { %2556 = vtanh.f32 %v341_v37  ;;  %v2089_v40 = vmul.f32 -1.442695, %v341_v37 }
 0x278   :  { %2558 = vpow2.f32 %v2089_v40 }
 0x280   :  { %v2557_v38 = vpop.eup %2556 }
 0x281   :  { %355 = vrot.lane.b32.xlu1 %v2557_v38, %s2833_s19 }
 0x282   :  { %v2559_v41 = vpop.eup %2558 }
 0x283   :  { %v345_v42 = vadd.f32 1.0, %v2559_v41 }
 0x285   :  { %350 = vrot.lane.b32.xlu1 %v266_v39, %s2834_s20  ;;  %2560 = vrcp.f32 %v345_v42 }
 0x28f   :  { %v2561_v43 = vpop.eup %2560 }
 0x2f3   :  { %v356_v44 = vpop.permute.xlu1 %355 }
 0x2f4   :  { %v358_v45 = vmul.f32 %v2561_v43, %v356_v44 }
 0x2f6   :  { %360 = vrot.lane.b32.xlu0 %v358_v45, %s2834_s20 }
 0x2f7   :  { %v351_v46 = vpop.permute.xlu1 %350 }
 0x2f8   :  { %v353_v47 = vmul.f32 %v2561_v43, %v351_v46 }
 0x368   :  { %v361_v48 = vpop.permute.xlu0 %360 }
 0x369   :  { %v363_v49 = vadd.f32 %v361_v48, %v353_v47  ;;  %v685_v48 = vld [vmem:[#allocation2 + $0x8] sm:$0x3] }
 0x36b   :  { %2562 = vtanh.f32 %v363_v49 }
 0x375   :  { %v2563_v50 = vpop.eup %2562 }
 0x376   :  { %366 = vrot.lane.b32.xlu1 %v2563_v50, %s2833_s19 }
 0x3e8   :  { %v367_v51 = vpop.permute.xlu1 %366 }
 0x3e9   :  { %v369_v52 = vmul.f32 %v2561_v43, %v367_v51 }
 0x3eb   :  { %371 = vrot.lane.b32.xlu0 %v369_v52, %s2834_s20 }
 0x45d   :  { %v372_v53 = vpop.permute.xlu0 %371 }
 0x45e   :  { %375 = vst.msk [vmem:[#allocation9] sm:$0x3] %vm374_vm5, %v372_v53  ;;  %2257 = vmatmul.mubr.msk.f32.vlgmr.msra.gmra.mrb[2].mxu1 %vm181_vm4, %v372_v53 }
 0x45f   :  { %2456 = vmatpush3.bf16.msra.mxu1 %v2959_v23  ;;  %2278 = vmatprep.mubr.msk.f32.mxu1 %vm2832_vm3, %v2830_v15 }
 0x460   :  { %2457 = vmatprep.subr.bf16.mxu1 %v2831_v22 }
 0x463   :  { %2459 = vmatpush3.bf16.msra.mxu1 %v2965_v25 }
 0x464   :  { %2466 = vmatprep.subr.bf16.mxu1 %v2831_v22 }
 0x531   :  { %v445_v55 = vpop.f32.mrb[2].mxu1 }
 0x532   :  { %v449_v56 = vadd.f32 %v445_v55, %v376_v54  ;;  %v2258_v57 = vpop.f32.mrb[3].mxu1 }
 0x534   :  { %2564 = vtanh.f32 %v449_v56  ;;  %v2091_v59 = vmul.f32 -1.442695, %v449_v56 }
 0x536   :  { %2566 = vpow2.f32 %v2091_v59 }
 0x53e   :  { %v2565_v58 = vpop.eup %2564 }
 0x53f   :  { %459 = vrot.lane.b32.xlu1 %v2565_v58, %s2833_s19 }
 0x540   :  { %v2567_v60 = vpop.eup %2566 }
 0x541   :  { %v453_v61 = vadd.f32 1.0, %v2567_v60 }
 0x543   :  { %2568 = vrcp.f32 %v453_v61 }
 0x54d   :  { %v2569_v62 = vpop.eup %2568 }
 0x54e   :  { %v457_v1 = vmul.f32 %v2569_v62, %v363_v49 }
 0x5b1   :  { %v460_v63 = vpop.permute.xlu1 %459 }
 0x5b2   :  { %v462_v0 = vmul.f32 %v2569_v62, %v460_v63 }
 0x5b4   :  { %464 = vrot.lane.b32.xlu0 %v462_v0, %s2834_s20 }
 0x626   :  { %v465_v2 = vpop.permute.xlu0 %464 }
 0x627   :  { %v467_v3 = vadd.f32 %v465_v2, %v457_v1  ;;  %v788_v2 = vld [vmem:[#allocation2 + $0xa] sm:$0x3] }
 0x629   :  { %2570 = vtanh.f32 %v467_v3 }
 0x633   :  { %v2571_v4 = vpop.eup %2570 }
 0x634   :  { %470 = vrot.lane.b32.xlu1 %v2571_v4, %s2833_s19 }
 0x6a6   :  { %v471_v5 = vpop.permute.xlu1 %470 }
 0x6a7   :  { %v473_v6 = vmul.f32 %v2569_v62, %v471_v5 }
 0x6a9   :  { %475 = vrot.lane.b32.xlu0 %v473_v6, %s2834_s20 }
 0x71b   :  { %v476_v7 = vpop.permute.xlu0 %475 }
 0x71c   :  { %478 = vst.msk [vmem:[#allocation9 + $0x2] sm:$0x3] %vm374_vm5, %v476_v7  ;;  %2268 = vmatmul.mubr.msk.f32.vlgmr.msra.gmra.mrb[4].mxu0 %vm181_vm4, %v476_v7 }
 0x71d   :  { %2462 = vmatpush3.bf16.msra.mxu0 %v2959_v23  ;;  %2289 = vmatprep.mubr.msk.f32.mxu0 %vm2832_vm3, %v2830_v15 }
 0x71e   :  { %2463 = vmatprep.subr.bf16.mxu0 %v2831_v22 }
 0x721   :  { %2465 = vmatpush3.bf16.msra.mxu0 %v2965_v25 }
 0x722   :  { %2472 = vmatprep.subr.bf16.mxu0 %v2831_v22 }
 0x7ef   :  { %v548_v9 = vpop.f32.mrb[4].mxu0 }
 0x7f0   :  { %v552_v10 = vadd.f32 %v548_v9, %v479_v8  ;;  %v2269_v11 = vpop.f32.mrb[5].mxu0 }
 0x7f2   :  { %2572 = vtanh.f32 %v552_v10  ;;  %v2093_v13 = vmul.f32 -1.442695, %v552_v10 }
 0x7f4   :  { %2574 = vpow2.f32 %v2093_v13 }
 0x7fc   :  { %v2573_v12 = vpop.eup %2572 }
 0x7fd   :  { %562 = vrot.lane.b32.xlu1 %v2573_v12, %s2833_s19 }
 0x7fe   :  { %v2575_v14 = vpop.eup %2574 }
 0x7ff   :  { %v556_v16 = vadd.f32 1.0, %v2575_v14 }
 0x801   :  { %2576 = vrcp.f32 %v556_v16 }
 0x80b   :  { %v2577_v17 = vpop.eup %2576 }
 0x80c   :  { %v560_v20 = vmul.f32 %v2577_v17, %v467_v3 }
 0x86f   :  { %v563_v18 = vpop.permute.xlu1 %562 }
 0x870   :  { %v565_v19 = vmul.f32 %v2577_v17, %v563_v18 }
 0x872   :  { %567 = vrot.lane.b32.xlu0 %v565_v19, %s2834_s20 }
 0x8e4   :  { %v568_v21 = vpop.permute.xlu0 %567 }
 0x8e5   :  { %v570_v24 = vadd.f32 %v568_v21, %v560_v20  ;;  %v891_v20 = vld [vmem:[#allocation2 + $0xc] sm:$0x3] }
 0x8e7   :  { %2578 = vtanh.f32 %v570_v24 }
 0x8f1   :  { %v2579_v26 = vpop.eup %2578 }
 0x8f2   :  { %573 = vrot.lane.b32.xlu1 %v2579_v26, %s2833_s19 }
 0x964   :  { %v574_v27 = vpop.permute.xlu1 %573 }
 0x965   :  { %v576_v28 = vmul.f32 %v2577_v17, %v574_v27 }
 0x967   :  { %578 = vrot.lane.b32.xlu0 %v576_v28, %s2834_s20 }
 0x9d9   :  { %v579_v29 = vpop.permute.xlu0 %578 }
 0x9da   :  { %581 = vst.msk [vmem:[#allocation9 + $0x4] sm:$0x3] %vm374_vm5, %v579_v29  ;;  %2279 = vmatmul.mubr.msk.f32.vlgmr.msra.gmra.mrb[4].mxu1 %vm181_vm4, %v579_v29 }
 0x9db   :  { %2468 = vmatpush3.bf16.msra.mxu1 %v2959_v23  ;;  %2300 = vmatprep.mubr.msk.f32.mxu1 %vm2832_vm3, %v2830_v15 }
 0x9dc   :  { %2469 = vmatprep.subr.bf16.mxu1 %v2831_v22 }
 0x9df   :  { %2471 = vmatpush3.bf16.msra.mxu1 %v2965_v25 }
 0x9e0   :  { %2478 = vmatprep.subr.bf16.mxu1 %v2831_v22 }
 0xaad   :  { %v651_v31 = vpop.f32.mrb[4].mxu1 }
 0xaae   :  { %v655_v32 = vadd.f32 %v651_v31, %v582_v30  ;;  %v2280_v33 = vpop.f32.mrb[5].mxu1 }
 0xab0   :  { %2580 = vtanh.f32 %v655_v32  ;;  %v2095_v35 = vmul.f32 -1.442695, %v655_v32 }
 0xab2   :  { %2582 = vpow2.f32 %v2095_v35 }
 0xaba   :  { %v2581_v34 = vpop.eup %2580 }
 0xabb   :  { %665 = vrot.lane.b32.xlu1 %v2581_v34, %s2833_s19 }
 0xabc   :  { %v2583_v36 = vpop.eup %2582 }
 0xabd   :  { %v659_v37 = vadd.f32 1.0, %v2583_v36 }
 0xabf   :  { %2584 = vrcp.f32 %v659_v37 }
 0xac9   :  { %v2585_v38 = vpop.eup %2584 }
 0xaca   :  { %v663_v41 = vmul.f32 %v2585_v38, %v570_v24 }
 0xb2d   :  { %v666_v39 = vpop.permute.xlu1 %665 }
 0xb2e   :  { %v668_v40 = vmul.f32 %v2585_v38, %v666_v39 }
 0xb30   :  { %670 = vrot.lane.b32.xlu0 %v668_v40, %s2834_s20 }
 0xba2   :  { %v671_v42 = vpop.permute.xlu0 %670 }
 0xba3   :  { %v673_v43 = vadd.f32 %v671_v42, %v663_v41  ;;  %v994_v41 = vld [vmem:[#allocation2 + $0xe] sm:$0x3] }
 0xba5   :  { %2586 = vtanh.f32 %v673_v43 }
 0xbaf   :  { %v2587_v44 = vpop.eup %2586 }
 0xbb0   :  { %676 = vrot.lane.b32.xlu1 %v2587_v44, %s2833_s19 }
 0xc22   :  { %v677_v45 = vpop.permute.xlu1 %676 }
 0xc23   :  { %v679_v46 = vmul.f32 %v2585_v38, %v677_v45 }
 0xc25   :  { %681 = vrot.lane.b32.xlu0 %v679_v46, %s2834_s20 }
 0xc97   :  { %v682_v47 = vpop.permute.xlu0 %681 }
 0xc98   :  { %684 = vst.msk [vmem:[#allocation9 + $0x6] sm:$0x3] %vm374_vm5, %v682_v47  ;;  %2290 = vmatmul.mubr.msk.f32.vlgmr.msra.gmra.mrb[6].mxu0 %vm181_vm4, %v682_v47 }
 0xc99   :  { %2474 = vmatpush3.bf16.msra.mxu0 %v2959_v23  ;;  %2311 = vmatprep.mubr.msk.f32.mxu0 %vm2832_vm3, %v2830_v15 }
 0xc9a   :  { %2475 = vmatprep.subr.bf16.mxu0 %v2831_v22 }
 0xc9d   :  { %2477 = vmatpush3.bf16.msra.mxu0 %v2965_v25 }
 0xc9f   :  { %v1103_v19 = vld [vmem:[#allocation9] sm:$0xff] }
 0xd6b   :  { %v754_v49 = vpop.f32.mrb[6].mxu0 }
 0xd6c   :  { %v758_v50 = vadd.f32 %v754_v49, %v685_v48  ;;  %v2291_v51 = vpop.f32.mrb[7].mxu0 }
 0xd6e   :  { %2588 = vtanh.f32 %v758_v50  ;;  %v2097_v53 = vmul.f32 -1.442695, %v758_v50 }
 0xd70   :  { %2590 = vpow2.f32 %v2097_v53 }
 0xd78   :  { %v2589_v52 = vpop.eup %2588 }
 0xd79   :  { %768 = vrot.lane.b32.xlu1 %v2589_v52, %s2833_s19 }
 0xd7a   :  { %v2591_v54 = vpop.eup %2590 }
 0xd7b   :  { %v762_v55 = vadd.f32 1.0, %v2591_v54 }
 0xd7d   :  { %2592 = vrcp.f32 %v762_v55 }
 0xd87   :  { %v2593_v56 = vpop.eup %2592 }
 0xd88   :  { %v766_v59 = vmul.f32 %v2593_v56, %v673_v43 }
 0xdeb   :  { %v769_v57 = vpop.permute.xlu1 %768 }
 0xdec   :  { %v771_v58 = vmul.f32 %v2593_v56, %v769_v57  ;;  %v1106_v57 = vld [vmem:[%s3251_s2 + $0x28] sm:$0xff] }
 0xdee   :  { %773 = vrot.lane.b32.xlu0 %v771_v58, %s2834_s20 }
 0xe60   :  { %v774_v60 = vpop.permute.xlu0 %773 }
 0xe61   :  { %v776_v61 = vadd.f32 %v774_v60, %v766_v59  ;;  %v1107_v59 = vld [vmem:[%s3251_s2 + $0x30] sm:$0xff]  ;;  %v1108_v60 = vld [vmem:[%s3251_s2 + $0x38] sm:$0xff] }
 0xe63   :  { %2594 = vtanh.f32 %v776_v61 }
 0xe6d   :  { %v2595_v62 = vpop.eup %2594 }
 0xe6e   :  { %779 = vrot.lane.b32.xlu1 %v2595_v62, %s2833_s19  ;;  %v1109_v62 = vld [vmem:[#allocation6 + $0x20] sm:$0xff] }
 0xee0   :  { %v780_v63 = vpop.permute.xlu1 %779 }
 0xee1   :  { %v782_v0 = vmul.f32 %v2593_v56, %v780_v63  ;;  %v1105_v56 = vld [vmem:[%s3251_s2 + $0x20] sm:$0xff]  ;;  %v1110_v63 = vld [vmem:[#allocation6 + $0x28] sm:$0xff] }
 0xee2   :  { %v2484_v58 = vpack.c.bf16 %v1106_v57, %v1105_v56 }
 0xee3   :  { %784 = vrot.lane.b32.xlu0 %v782_v0, %s2834_s20  ;;  %v1111_v0 = vld [vmem:[#allocation6 + $0x30] sm:$0xff] }
 0xee4   :  { %2485 = vmatprep.subr.bf16.mxu0 %v2484_v58 }
 0xf55   :  { %v785_v1 = vpop.permute.xlu0 %784 }
 0xf56   :  { %787 = vst.msk [vmem:[#allocation9 + $0x8] sm:$0x3] %vm374_vm5, %v785_v1  ;;  %2301 = vmatmul.mubr.msk.f32.vlgmr.msra.gmra.mrb[6].mxu1 %vm181_vm4, %v785_v1  ;;  %v3085_v1 = vpack.c.bf16 %v1110_v63, %v1109_v62 }
 0xf57   :  { %2480 = vmatpush3.bf16.msra.mxu1 %v2959_v23  ;;  %2322 = vmatprep.mubr.msk.f32.mxu1 %vm2832_vm3, %v2830_v15 }
 0xf58   :  { %2481 = vmatprep.subr.bf16.mxu1 %v2831_v22 }
 0xf5b   :  { %2483 = vmatpush3.bf16.msra.mxu1 %v2965_v25 }
 0xf5c   :  { %2492 = vmatprep.subr.bf16.mxu1 %v2831_v22 }
0x1029   :  { %v857_v3 = vpop.f32.mrb[6].mxu1 }
0x102a   :  { %v861_v4 = vadd.f32 %v857_v3, %v788_v2  ;;  %v2302_v5 = vpop.f32.mrb[7].mxu1  ;;  %v1112_v2 = vld [vmem:[#allocation6 + $0x38] sm:$0xff] }
0x102b   :  { %v3088_v5 = vpack.c.bf16 %v1112_v2, %v1111_v0 }
0x102c   :  { %2596 = vtanh.f32 %v861_v4  ;;  %v2099_v7 = vmul.f32 -1.442695, %v861_v4 }
0x102e   :  { %2598 = vpow2.f32 %v2099_v7  ;;  %v1201_v7 = vld [vmem:[%s3254_s5 + $0x2] sm:$0x3] }
0x1036   :  { %v2597_v6 = vpop.eup %2596 }
0x1037   :  { %871 = vrot.lane.b32.xlu1 %v2597_v6, %s2833_s19  ;;  %v1202_v6 = vld [vmem:[#allocation8 + $0x2] sm:$0x3] }
0x1038   :  { %v2599_v23 = vpop.eup %2598 }
0x1039   :  { %v865_v8 = vadd.f32 1.0, %v2599_v23 }
0x103b   :  { %2600 = vrcp.f32 %v865_v8 }
0x1045   :  { %v2601_v9 = vpop.eup %2600 }
0x1046   :  { %v869_v25 = vmul.f32 %v2601_v9, %v776_v61  ;;  %v2488_v61 = vpack.c.bf16 %v1108_v60, %v1107_v59 }
0x10a9   :  { %v872_v10 = vpop.permute.xlu1 %871 }
0x10aa   :  { %v874_v11 = vmul.f32 %v2601_v9, %v872_v10 }
0x10ac   :  { %876 = vrot.lane.b32.xlu0 %v874_v11, %s2834_s20  ;;  %v2104_v11 = vld [vmem:[%s3253_s4 + $0x1] ss:$0 sm:$0xff]  ;;  %s2835_s4 = smov 96  }
0x111e   :  { %v877_v12 = vpop.permute.xlu0 %876 }
0x111f   :  { %v879_v13 = vadd.f32 %v877_v12, %v869_v25 }
0x1121   :  { %2602 = vtanh.f32 %v879_v13 }
0x112b   :  { %v2603_v14 = vpop.eup %2602 }
0x112c   :  { %882 = vrot.lane.b32.xlu1 %v2603_v14, %s2833_s19 }
0x119e   :  { %v883_v16 = vpop.permute.xlu1 %882 }
0x119f   :  { %v885_v17 = vmul.f32 %v2601_v9, %v883_v16 }
0x11a1   :  { %887 = vrot.lane.b32.xlu0 %v885_v17, %s2834_s20 }
0x1213   :  { %v888_v18 = vpop.permute.xlu0 %887 }
0x1214   :  { %890 = vst.msk [vmem:[#allocation9 + $0xa] sm:$0x3] %vm374_vm5, %v888_v18  ;;  %2312 = vmatmul.mubr.msk.f32.vlgmr.msra.gmra.mrb[8].mxu0 %vm181_vm4, %v888_v18 }
0x1215   :  { %2333 = vmatprep.mubr.msk.f32.mxu0 %vm181_vm4, %v1103_v19  ;;  %2487 = vmatpush3.bf16.msra.mxu0 %v2484_v58 }
0x1216   :  { %2489 = vmatprep.subr.bf16.mxu0 %v2488_v61 }
0x1219   :  { %2491 = vmatpush3.bf16.msra.mxu0 %v2488_v61 }
0x121a   :  { %2498 = vmatprep.subr.bf16.mxu0 %v2831_v22 }
0x12e7   :  { %v960_v21 = vpop.f32.mrb[8].mxu0 }
0x12e8   :  { %v964_v24 = vadd.f32 %v960_v21, %v891_v20  ;;  %v2313_v26 = vpop.f32.mrb[9].mxu0 }
0x12ea   :  { %2604 = vtanh.f32 %v964_v24  ;;  %v2101_v28 = vmul.f32 -1.442695, %v964_v24 }
0x12ec   :  { %2606 = vpow2.f32 %v2101_v28 }
0x12f4   :  { %v2605_v27 = vpop.eup %2604 }
0x12f5   :  { %974 = vrot.lane.b32.xlu1 %v2605_v27, %s2833_s19 }
0x12f6   :  { %v2607_v29 = vpop.eup %2606 }
0x12f7   :  { %v968_v30 = vadd.f32 1.0, %v2607_v29 }
0x12f9   :  { %2608 = vrcp.f32 %v968_v30 }
0x1303   :  { %v2609_v31 = vpop.eup %2608 }
0x1304   :  { %v972_v34 = vmul.f32 %v2609_v31, %v879_v13 }
0x1367   :  { %v975_v32 = vpop.permute.xlu1 %974 }
0x1368   :  { %v977_v33 = vmul.f32 %v2609_v31, %v975_v32 }
0x136a   :  { %979 = vrot.lane.b32.xlu0 %v977_v33, %s2834_s20 }
0x13dc   :  { %v980_v35 = vpop.permute.xlu0 %979 }
0x13dd   :  { %v982_v36 = vadd.f32 %v980_v35, %v972_v34 }
0x13df   :  { %2610 = vtanh.f32 %v982_v36 }
0x13e9   :  { %v2611_v37 = vpop.eup %2610 }
0x13ea   :  { %985 = vrot.lane.b32.xlu1 %v2611_v37, %s2833_s19 }
0x145c   :  { %v986_v38 = vpop.permute.xlu1 %985 }
0x145d   :  { %v988_v39 = vmul.f32 %v2609_v31, %v986_v38 }
0x145f   :  { %990 = vrot.lane.b32.xlu0 %v988_v39, %s2834_s20 }
0x14d1   :  { %v991_v40 = vpop.permute.xlu0 %990 }
0x14d2   :  { %993 = vst.msk [vmem:[#allocation9 + $0xc] sm:$0x3] %vm374_vm5, %v991_v40  ;;  %2323 = vmatmul.mubr.msk.f32.vlgmr.msra.gmra.mrb[8].mxu1 %vm181_vm4, %v991_v40 }
0x14d3   :  { %2344 = vmatprep.mubr.msk.f32.mxu1 %vm2832_vm3, %v2830_v15  ;;  %2494 = vmatpush3.bf16.msra.mxu1 %v3085_v1 }
0x14d4   :  { %2495 = vmatprep.subr.bf16.mxu1 %v2831_v22 }
0x14d7   :  { %2497 = vmatpush3.bf16.msra.mxu1 %v3088_v5 }
0x14d8   :  { %2504 = vmatprep.subr.bf16.mxu1 %v2831_v22 }
0x14da   :  { %2345 = vmatmul.mubr.msk.f32.vlgmr.msra.gmra.mrb[10].mxu1 %vm181_vm4, %v1201_v7 }
0x14db   :  { %2506 = vmatpush3.bf16.msra.mxu1 %v3085_v1  ;;  %2366 = vmatprep.mubr.msk.f32.mxu1 %vm2832_vm3, %v2830_v15 }
0x14dc   :  { %2507 = vmatprep.subr.bf16.mxu1 %v2831_v22 }
0x14df   :  { %2509 = vmatpush3.bf16.msra.mxu1 %v3088_v5 }
0x14e0   :  { %2516 = vmatprep.subr.bf16.mxu1 %v2831_v22 }
0x15a5   :  { %v1063_v42 = vpop.f32.mrb[8].mxu1 }
0x15a6   :  { %v1067_v43 = vadd.f32 %v1063_v42, %v994_v41  ;;  %v2324_v44 = vpop.f32.mrb[9].mxu1 }
0x15a8   :  { %2612 = vtanh.f32 %v1067_v43  ;;  %v2103_v46 = vmul.f32 -1.442695, %v1067_v43 }
0x15aa   :  { %2614 = vpow2.f32 %v2103_v46 }
0x15ad   :  { %v1273_v9 = vpop.f32.mrb[10].mxu1 }
0x15ae   :  { %v2346_v10 = vpop.f32.mrb[11].mxu1 }
0x15b2   :  { %v2613_v45 = vpop.eup %2612 }
0x15b3   :  { %1077 = vrot.lane.b32.xlu1 %v2613_v45, %s2833_s19 }
0x15b4   :  { %v2615_v47 = vpop.eup %2614 }
0x15b5   :  { %v1071_v48 = vadd.f32 1.0, %v2615_v47 }
0x15b7   :  { %2616 = vrcp.f32 %v1071_v48 }
0x15c1   :  { %v2617_v49 = vpop.eup %2616 }
0x15c2   :  { %v1075_v52 = vmul.f32 %v2617_v49, %v982_v36 }
0x1625   :  { %v1078_v50 = vpop.permute.xlu1 %1077 }
0x1626   :  { %v1080_v51 = vmul.f32 %v2617_v49, %v1078_v50 }
0x1628   :  { %1082 = vrot.lane.b32.xlu0 %v1080_v51, %s2834_s20 }
0x169a   :  { %v1083_v53 = vpop.permute.xlu0 %1082 }
0x169b   :  { %v3068_v54 = vadd.f32 %v1083_v53, %v1075_v52 }
0x169d   :  { %2618 = vtanh.f32 %v3068_v54 }
0x16a7   :  { %v2619_v55 = vpop.eup %2618 }
0x16a8   :  { %1088 = vrot.lane.b32.xlu1 %v2619_v55, %s2833_s19 }
0x171a   :  { %v1089_v3 = vpop.permute.xlu1 %1088 }
0x171b   :  { %v1091_v4 = vmul.f32 %v2617_v49, %v1089_v3 }
0x171d   :  { %1093 = vrot.lane.b32.xlu0 %v1091_v4, %s2834_s20 }
0x1721   :  { %1286 = vrot.lane.b32.xlu0 %v1202_v6, %s2834_s20 }
0x178f   :  { %v1094_v23 = vpop.permute.xlu0 %1093 }
0x1790   :  { %1096 = vst.msk [vmem:[#allocation9 + $0xe] sm:$0x3] %vm374_vm5, %v1094_v23  ;;  %1097 = vst.msk [vmem:[#allocation10] sm:$0x3] %vm374_vm5, %v1094_v23 }
0x1793   :  { %v1287_v28 = vpop.permute.xlu0 %1286 }
0x1797   :  { %v1104_v8 = vld [vmem:[#allocation9 + $0x8] sm:$0xff] }
0x1798   :  { %2334 = vmatmul.mubr.msk.f32.vlgmr.msra.gmra.mrb[10].mxu0 %vm181_vm4, %v1104_v8 }
0x1799   :  { %2500 = vmatpush3.bf16.msra.mxu0 %v3085_v1  ;;  %2355 = vmatprep.mubr.msk.f32.mxu0 %vm2832_vm3, %v2830_v15 }
0x179a   :  { %2501 = vmatprep.subr.bf16.mxu0 %v2831_v22 }
0x179d   :  { %2503 = vmatpush3.bf16.msra.mxu0 %v3088_v5 }
0x179e   :  { %2510 = vmatprep.subr.bf16.mxu0 %v2831_v22 }
0x186b   :  { %v2335_v25 = vpop.f32.mrb[10].mxu0 }
0x186c   :  { %v1196_v12 = vadd.f32 %v2335_v25, %v2104_v11  ;;  %v1190_v13 = vpop.f32.mrb[11].mxu0 }
0x186d   :  { %v1191_v14 = vadd.f32 %v2104_v11, %v1190_v13 }
0x186e   :  { %1200 = vst [vmem:[#allocation2 + $0x8] sm:$0xff] %v1196_v12 }
0x186f   :  { %1199 = vst [vmem:[#allocation2] sm:$0xff] %v1191_v14 }
0x1876   :  { %v1203_v16 = vld [vmem:[#allocation2] sm:$0x3]  ;;  %v1311_v36 = vld [vmem:[#allocation2 + $0x2] sm:$0x3]  ;;  %v1414_v55 = vld [vmem:[#allocation2 + $0x4] sm:$0x3] }
0x1877   :  { %v1277_v17 = vadd.f32 %v1273_v9, %v1203_v16  ;;  %v1517_v10 = vld [vmem:[#allocation2 + $0x6] sm:$0x3] }
0x1879   :  { %2620 = vtanh.f32 %v1277_v17  ;;  %v2108_v19 = vmul.f32 -1.442695, %v1277_v17 }
0x187b   :  { %2622 = vpow2.f32 %v2108_v19 }
0x1883   :  { %v2621_v18 = vpop.eup %2620 }
0x1884   :  { %1291 = vrot.lane.b32.xlu1 %v2621_v18, %s2833_s19 }
0x1885   :  { %v2623_v20 = vpop.eup %2622 }
0x1886   :  { %v1281_v21 = vadd.f32 1.0, %v2623_v20 }
0x1888   :  { %2624 = vrcp.f32 %v1281_v21 }
0x1892   :  { %v2625_v24 = vpop.eup %2624 }
0x1893   :  { %v1289_v29 = vmul.f32 %v2625_v24, %v1287_v28 }
0x18f6   :  { %v1292_v26 = vpop.permute.xlu1 %1291 }
0x18f7   :  { %v1294_v27 = vmul.f32 %v2625_v24, %v1292_v26 }
0x18f9   :  { %1296 = vrot.lane.b32.xlu1 %v1294_v27, %s2834_s20 }
0x196b   :  { %v1297_v30 = vpop.permute.xlu1 %1296 }
0x196c   :  { %v1299_v31 = vadd.f32 %v1297_v30, %v1289_v29 }
0x196e   :  { %2626 = vtanh.f32 %v1299_v31 }
0x1978   :  { %v2627_v32 = vpop.eup %2626 }
0x1979   :  { %1302 = vrot.lane.b32.xlu0 %v2627_v32, %s2833_s19 }
0x19eb   :  { %v1303_v33 = vpop.permute.xlu0 %1302 }
0x19ec   :  { %v1305_v34 = vmul.f32 %v2625_v24, %v1303_v33 }
0x19ee   :  { %1307 = vrot.lane.b32.xlu1 %v1305_v34, %s2834_s20 }
0x1a60   :  { %v1308_v35 = vpop.permute.xlu1 %1307 }
0x1a61   :  { %1310 = vst.msk [vmem:[#allocation9] sm:$0x3] %vm374_vm5, %v1308_v35  ;;  %2356 = vmatmul.mubr.msk.f32.vlgmr.msra.gmra.mrb[12].mxu0 %vm181_vm4, %v1308_v35 }
0x1a62   :  { %2512 = vmatpush3.bf16.msra.mxu0 %v3085_v1  ;;  %2377 = vmatprep.mubr.msk.f32.mxu0 %vm2832_vm3, %v2830_v15 }
0x1a63   :  { %2513 = vmatprep.subr.bf16.mxu0 %v2831_v22 }
0x1a66   :  { %2515 = vmatpush3.bf16.msra.mxu0 %v3088_v5 }
0x1a67   :  { %2522 = vmatprep.subr.bf16.mxu0 %v2831_v22 }
0x1b34   :  { %v1380_v37 = vpop.f32.mrb[12].mxu0 }
0x1b35   :  { %v1384_v38 = vadd.f32 %v1380_v37, %v1311_v36  ;;  %v2357_v39 = vpop.f32.mrb[13].mxu0 }
0x1b37   :  { %2628 = vtanh.f32 %v1384_v38  ;;  %v2110_v41 = vmul.f32 -1.442695, %v1384_v38 }
0x1b39   :  { %2630 = vpow2.f32 %v2110_v41 }
0x1b41   :  { %v2629_v40 = vpop.eup %2628 }
0x1b42   :  { %1394 = vrot.lane.b32.xlu0 %v2629_v40, %s2833_s19 }
0x1b43   :  { %v2631_v42 = vpop.eup %2630 }
0x1b44   :  { %v1388_v43 = vadd.f32 1.0, %v2631_v42 }
0x1b46   :  { %2632 = vrcp.f32 %v1388_v43 }
0x1b50   :  { %v2633_v44 = vpop.eup %2632 }
0x1b51   :  { %v1392_v47 = vmul.f32 %v2633_v44, %v1299_v31  ;;  %v1620_v31 = vld [vmem:[#allocation2 + $0x8] sm:$0x3] }
0x1bb4   :  { %v1395_v45 = vpop.permute.xlu0 %1394 }
0x1bb5   :  { %v1397_v46 = vmul.f32 %v2633_v44, %v1395_v45 }
0x1bb7   :  { %1399 = vrot.lane.b32.xlu1 %v1397_v46, %s2834_s20 }
0x1c29   :  { %v1400_v48 = vpop.permute.xlu1 %1399 }
0x1c2a   :  { %v1402_v49 = vadd.f32 %v1400_v48, %v1392_v47 }
0x1c2c   :  { %2634 = vtanh.f32 %v1402_v49 }
0x1c36   :  { %v2635_v50 = vpop.eup %2634 }
0x1c37   :  { %1405 = vrot.lane.b32.xlu0 %v2635_v50, %s2833_s19 }
0x1ca9   :  { %v1406_v51 = vpop.permute.xlu0 %1405 }
0x1caa   :  { %v1408_v52 = vmul.f32 %v2633_v44, %v1406_v51 }
0x1cac   :  { %1410 = vrot.lane.b32.xlu1 %v1408_v52, %s2834_s20 }
0x1d1e   :  { %v1411_v53 = vpop.permute.xlu1 %1410 }
0x1d1f   :  { %1413 = vst.msk [vmem:[#allocation9 + $0x2] sm:$0x3] %vm374_vm5, %v1411_v53  ;;  %2367 = vmatmul.mubr.msk.f32.vlgmr.msra.gmra.mrb[12].mxu1 %vm181_vm4, %v1411_v53 }
0x1d20   :  { %2518 = vmatpush3.bf16.msra.mxu1 %v3085_v1  ;;  %2388 = vmatprep.mubr.msk.f32.mxu1 %vm2832_vm3, %v2830_v15 }
0x1d21   :  { %2519 = vmatprep.subr.bf16.mxu1 %v2831_v22 }
0x1d24   :  { %2521 = vmatpush3.bf16.msra.mxu1 %v3088_v5 }
0x1d25   :  { %2528 = vmatprep.subr.bf16.mxu1 %v2831_v22 }
0x1df2   :  { %v1483_v56 = vpop.f32.mrb[12].mxu1 }
0x1df3   :  { %v1487_v57 = vadd.f32 %v1483_v56, %v1414_v55  ;;  %v2368_v58 = vpop.f32.mrb[13].mxu1 }
0x1df5   :  { %2636 = vtanh.f32 %v1487_v57  ;;  %v2112_v60 = vmul.f32 -1.442695, %v1487_v57 }
0x1df7   :  { %2638 = vpow2.f32 %v2112_v60 }
0x1dff   :  { %v2637_v59 = vpop.eup %2636 }
0x1e00   :  { %1497 = vrot.lane.b32.xlu0 %v2637_v59, %s2833_s19 }
0x1e01   :  { %v2639_v61 = vpop.eup %2638 }
0x1e02   :  { %v1491_v62 = vadd.f32 1.0, %v2639_v61 }
0x1e04   :  { %2640 = vrcp.f32 %v1491_v62 }
0x1e0e   :  { %v2641_v63 = vpop.eup %2640 }
0x1e0f   :  { %v1495_v3 = vmul.f32 %v2641_v63, %v1402_v49  ;;  %v1723_v49 = vld [vmem:[#allocation2 + $0xa] sm:$0x3] }
0x1e72   :  { %v1498_v0 = vpop.permute.xlu0 %1497 }
0x1e73   :  { %v1500_v2 = vmul.f32 %v2641_v63, %v1498_v0  ;;  %v1826_v0 = vld [vmem:[#allocation2 + $0xc] sm:$0x3] }
0x1e75   :  { %1502 = vrot.lane.b32.xlu1 %v1500_v2, %s2834_s20 }
0x1ee7   :  { %v1503_v4 = vpop.permute.xlu1 %1502 }
0x1ee8   :  { %v1505_v6 = vadd.f32 %v1503_v4, %v1495_v3 }
0x1eea   :  { %2642 = vtanh.f32 %v1505_v6 }
0x1ef4   :  { %v2643_v7 = vpop.eup %2642 }
0x1ef5   :  { %1508 = vrot.lane.b32.xlu0 %v2643_v7, %s2833_s19 }
0x1f67   :  { %v1509_v23 = vpop.permute.xlu0 %1508 }
0x1f68   :  { %v1511_v8 = vmul.f32 %v2641_v63, %v1509_v23 }
0x1f6a   :  { %1513 = vrot.lane.b32.xlu1 %v1511_v8, %s2834_s20 }
0x1fdc   :  { %v1514_v9 = vpop.permute.xlu1 %1513 }
0x1fdd   :  { %1516 = vst.msk [vmem:[#allocation9 + $0x4] sm:$0x3] %vm374_vm5, %v1514_v9  ;;  %2378 = vmatmul.mubr.msk.f32.vlgmr.msra.gmra.mrb[14].mxu0 %vm181_vm4, %v1514_v9 }
0x1fde   :  { %2524 = vmatpush3.bf16.msra.mxu0 %v3085_v1  ;;  %2399 = vmatprep.mubr.msk.f32.mxu0 %vm2832_vm3, %v2830_v15 }
0x1fdf   :  { %2525 = vmatprep.subr.bf16.mxu0 %v2831_v22 }
0x1fe2   :  { %2527 = vmatpush3.bf16.msra.mxu0 %v3088_v5 }
0x1fe3   :  { %2534 = vmatprep.subr.bf16.mxu0 %v2831_v22 }
0x20b0   :  { %v1586_v11 = vpop.f32.mrb[14].mxu0 }
0x20b1   :  { %v1590_v25 = vadd.f32 %v1586_v11, %v1517_v10  ;;  %v2379_v12 = vpop.f32.mrb[15].mxu0 }
0x20b3   :  { %2644 = vtanh.f32 %v1590_v25  ;;  %v2114_v14 = vmul.f32 -1.442695, %v1590_v25 }
0x20b5   :  { %2646 = vpow2.f32 %v2114_v14 }
0x20bd   :  { %v2645_v13 = vpop.eup %2644 }
0x20be   :  { %1600 = vrot.lane.b32.xlu0 %v2645_v13, %s2833_s19 }
0x20bf   :  { %v2647_v16 = vpop.eup %2646 }
0x20c0   :  { %v1594_v17 = vadd.f32 1.0, %v2647_v16 }
0x20c2   :  { %2648 = vrcp.f32 %v1594_v17 }
0x20cc   :  { %v2649_v18 = vpop.eup %2648 }
0x20cd   :  { %v1598_v21 = vmul.f32 %v2649_v18, %v1505_v6 }
0x2130   :  { %v1601_v19 = vpop.permute.xlu0 %1600 }
0x2131   :  { %v1603_v20 = vmul.f32 %v2649_v18, %v1601_v19  ;;  %v1929_v19 = vld [vmem:[#allocation2 + $0xe] sm:$0x3] }
0x2133   :  { %1605 = vrot.lane.b32.xlu1 %v1603_v20, %s2834_s20 }
0x21a5   :  { %v1606_v24 = vpop.permute.xlu1 %1605 }
0x21a6   :  { %v1608_v26 = vadd.f32 %v1606_v24, %v1598_v21 }
0x21a8   :  { %2650 = vtanh.f32 %v1608_v26 }
0x21b2   :  { %v2651_v27 = vpop.eup %2650 }
0x21b3   :  { %1611 = vrot.lane.b32.xlu0 %v2651_v27, %s2833_s19 }
0x2225   :  { %v1612_v28 = vpop.permute.xlu0 %1611 }
0x2226   :  { %v1614_v29 = vmul.f32 %v2649_v18, %v1612_v28 }
0x2228   :  { %1616 = vrot.lane.b32.xlu1 %v1614_v29, %s2834_s20 }
0x229a   :  { %v1617_v30 = vpop.permute.xlu1 %1616 }
0x229b   :  { %1619 = vst.msk [vmem:[#allocation9 + $0x6] sm:$0x3] %vm374_vm5, %v1617_v30  ;;  %2389 = vmatmul.mubr.msk.f32.vlgmr.msra.gmra.mrb[14].mxu1 %vm181_vm4, %v1617_v30 }
0x229c   :  { %2530 = vmatpush3.bf16.msra.mxu1 %v3085_v1  ;;  %2410 = vmatprep.mubr.msk.f32.mxu1 %vm2832_vm3, %v2830_v15 }
0x229d   :  { %2531 = vmatprep.subr.bf16.mxu1 %v2831_v22 }
0x22a0   :  { %2533 = vmatpush3.bf16.msra.mxu1 %v3088_v5 }
0x236e   :  { %v1689_v32 = vpop.f32.mrb[14].mxu1 }
0x236f   :  { %v1693_v33 = vadd.f32 %v1689_v32, %v1620_v31  ;;  %v2390_v34 = vpop.f32.mrb[15].mxu1 }
0x2371   :  { %2652 = vtanh.f32 %v1693_v33  ;;  %v2116_v36 = vmul.f32 -1.442695, %v1693_v33 }
0x2373   :  { %2654 = vpow2.f32 %v2116_v36 }
0x237b   :  { %v2653_v35 = vpop.eup %2652 }
0x237c   :  { %1703 = vrot.lane.b32.xlu0 %v2653_v35, %s2833_s19 }
0x237d   :  { %v2655_v37 = vpop.eup %2654 }
0x237e   :  { %v1697_v38 = vadd.f32 1.0, %v2655_v37 }
0x2380   :  { %2656 = vrcp.f32 %v1697_v38 }
0x238a   :  { %v2657_v39 = vpop.eup %2656 }
0x238b   :  { %v1701_v42 = vmul.f32 %v2657_v39, %v1608_v26 }
0x23ee   :  { %v1704_v40 = vpop.permute.xlu0 %1703 }
0x23ef   :  { %v1706_v41 = vmul.f32 %v2657_v39, %v1704_v40 }
0x23f1   :  { %1708 = vrot.lane.b32.xlu1 %v1706_v41, %s2834_s20 }
0x2463   :  { %v1709_v43 = vpop.permute.xlu1 %1708 }
0x2464   :  { %v1711_v44 = vadd.f32 %v1709_v43, %v1701_v42 }
0x2466   :  { %2658 = vtanh.f32 %v1711_v44 }
0x2470   :  { %v2659_v45 = vpop.eup %2658 }
0x2471   :  { %1714 = vrot.lane.b32.xlu0 %v2659_v45, %s2833_s19 }
0x24e3   :  { %v1715_v46 = vpop.permute.xlu0 %1714 }
0x24e4   :  { %v1717_v47 = vmul.f32 %v2657_v39, %v1715_v46 }
0x24e6   :  { %1719 = vrot.lane.b32.xlu1 %v1717_v47, %s2834_s20 }
0x2558   :  { %v1720_v48 = vpop.permute.xlu1 %1719 }
0x2559   :  { %1722 = vst.msk [vmem:[#allocation9 + $0x8] sm:$0x3] %vm374_vm5, %v1720_v48  ;;  %2400 = vmatmul.mubr.msk.f32.vlgmr.msra.gmra.mrb[16].mxu0 %vm181_vm4, %v1720_v48 }
0x255a   :  { %2536 = vmatpush3.bf16.msra.mxu0 %v3085_v1  ;;  %2421 = vmatprep.mubr.msk.f32.mxu0 %vm2832_vm3, %v2830_v15 }
0x255b   :  { %2537 = vmatprep.subr.bf16.mxu0 %v2831_v22 }
0x255e   :  { %2539 = vmatpush3.bf16.msra.mxu0 %v3088_v5 }
0x262c   :  { %v1792_v50 = vpop.f32.mrb[16].mxu0 }
0x262d   :  { %v1796_v51 = vadd.f32 %v1792_v50, %v1723_v49  ;;  %v2401_v52 = vpop.f32.mrb[17].mxu0 }
0x262f   :  { %2660 = vtanh.f32 %v1796_v51  ;;  %v2118_v55 = vmul.f32 -1.442695, %v1796_v51 }
0x2631   :  { %2662 = vpow2.f32 %v2118_v55 }
0x2639   :  { %v2661_v53 = vpop.eup %2660 }
0x263a   :  { %1806 = vrot.lane.b32.xlu0 %v2661_v53, %s2833_s19 }
0x263b   :  { %v2663_v56 = vpop.eup %2662 }
0x263c   :  { %v1800_v57 = vadd.f32 1.0, %v2663_v56 }
0x263e   :  { %2664 = vrcp.f32 %v1800_v57 }
0x2648   :  { %v2665_v1 = vpop.eup %2664 }
0x2649   :  { %v1804_v22 = vmul.f32 %v2665_v1, %v1711_v44 }
0x26ac   :  { %v1807_v58 = vpop.permute.xlu0 %1806 }
0x26ad   :  { %v1809_v15 = vmul.f32 %v2665_v1, %v1807_v58 }
0x26af   :  { %1811 = vrot.lane.b32.xlu1 %v1809_v15, %s2834_s20 }
0x2721   :  { %v1812_v5 = vpop.permute.xlu1 %1811 }
0x2722   :  { %v1814_v59 = vadd.f32 %v1812_v5, %v1804_v22 }
0x2724   :  { %2666 = vtanh.f32 %v1814_v59 }
0x272e   :  { %v2667_v60 = vpop.eup %2666 }
0x272f   :  { %1817 = vrot.lane.b32.xlu0 %v2667_v60, %s2833_s19 }
0x27a1   :  { %v1818_v61 = vpop.permute.xlu0 %1817 }
0x27a2   :  { %v1820_v62 = vmul.f32 %v2665_v1, %v1818_v61 }
0x27a4   :  { %1822 = vrot.lane.b32.xlu1 %v1820_v62, %s2834_s20 }
0x2816   :  { %v1823_v63 = vpop.permute.xlu1 %1822 }
0x2817   :  { %1825 = vst.msk [vmem:[#allocation9 + $0xa] sm:$0x3] %vm374_vm5, %v1823_v63  ;;  %2411 = vmatmul.mubr.msk.f32.vlgmr.msra.gmra.mrb[16].mxu1 %vm181_vm4, %v1823_v63 }
0x28ea   :  { %v1895_v2 = vpop.f32.mrb[16].mxu1 }
0x28eb   :  { %v1899_v3 = vadd.f32 %v1895_v2, %v1826_v0  ;;  %v2412_v4 = vpop.f32.mrb[17].mxu1 }
0x28ed   :  { %2668 = vtanh.f32 %v1899_v3  ;;  %v2120_v7 = vmul.f32 -1.442695, %v1899_v3 }
0x28ef   :  { %2670 = vpow2.f32 %v2120_v7 }
0x28f7   :  { %v2669_v6 = vpop.eup %2668 }
0x28f8   :  { %1909 = vrot.lane.b32.xlu0 %v2669_v6, %s2833_s19 }
0x28f9   :  { %v2671_v23 = vpop.eup %2670 }
0x28fa   :  { %v1903_v8 = vadd.f32 1.0, %v2671_v23 }
0x28fc   :  { %2672 = vrcp.f32 %v1903_v8 }
0x2906   :  { %v2673_v9 = vpop.eup %2672 }
0x2907   :  { %v1907_v25 = vmul.f32 %v2673_v9, %v1814_v59 }
0x296a   :  { %v1910_v10 = vpop.permute.xlu0 %1909 }
0x296b   :  { %v1912_v11 = vmul.f32 %v2673_v9, %v1910_v10 }
0x296d   :  { %1914 = vrot.lane.b32.xlu1 %v1912_v11, %s2834_s20 }
0x29df   :  { %v1915_v12 = vpop.permute.xlu1 %1914 }
0x29e0   :  { %v1917_v13 = vadd.f32 %v1915_v12, %v1907_v25 }
0x29e2   :  { %2674 = vtanh.f32 %v1917_v13 }
0x29ec   :  { %v2675_v14 = vpop.eup %2674 }
0x29ed   :  { %1920 = vrot.lane.b32.xlu0 %v2675_v14, %s2833_s19 }
0x2a5f   :  { %v1921_v16 = vpop.permute.xlu0 %1920 }
0x2a60   :  { %v1923_v17 = vmul.f32 %v2673_v9, %v1921_v16 }
0x2a62   :  { %1925 = vrot.lane.b32.xlu1 %v1923_v17, %s2834_s20 }
0x2ad4   :  { %v1926_v18 = vpop.permute.xlu1 %1925 }
0x2ad5   :  { %1928 = vst.msk [vmem:[#allocation9 + $0xc] sm:$0x3] %vm374_vm5, %v1926_v18  ;;  %2422 = vmatmul.mubr.msk.f32.vlgmr.msra.gmra.mrb[18].mxu0 %vm181_vm4, %v1926_v18 }
0x2ba8   :  { %v1998_v20 = vpop.f32.mrb[18].mxu0 }
0x2ba9   :  { %v2002_v21 = vadd.f32 %v1998_v20, %v1929_v19  ;;  %v2423_v24 = vpop.f32.mrb[19].mxu0 }
0x2bab   :  { %2676 = vtanh.f32 %v2002_v21  ;;  %v2122_v27 = vmul.f32 -1.442695, %v2002_v21 }
0x2bad   :  { %2678 = vpow2.f32 %v2122_v27 }
0x2bb5   :  { %v2677_v26 = vpop.eup %2676 }
0x2bb6   :  { %2012 = vrot.lane.b32.xlu0 %v2677_v26, %s2833_s19 }
0x2bb7   :  { %v2679_v28 = vpop.eup %2678 }
0x2bb8   :  { %v2006_v29 = vadd.f32 1.0, %v2679_v28 }
0x2bba   :  { %2680 = vrcp.f32 %v2006_v29 }
0x2bc4   :  { %v2681_v30 = vpop.eup %2680 }
0x2bc5   :  { %v2010_v33 = vmul.f32 %v2681_v30, %v1917_v13 }
0x2c28   :  { %v2013_v31 = vpop.permute.xlu0 %2012 }
0x2c29   :  { %v2015_v32 = vmul.f32 %v2681_v30, %v2013_v31 }
0x2c2b   :  { %2017 = vrot.lane.b32.xlu1 %v2015_v32, %s2834_s20 }
0x2c9d   :  { %v2018_v34 = vpop.permute.xlu1 %2017 }
0x2c9e   :  { %v2020_v35 = vadd.f32 %v2018_v34, %v2010_v33 }
0x2ca0   :  { %2682 = vtanh.f32 %v2020_v35 }
0x2caa   :  { %v2683_v36 = vpop.eup %2682 }
0x2cab   :  { %2023 = vrot.lane.b32.xlu0 %v2683_v36, %s2833_s19 }
0x2caf   :  { %1099 = vrot.lane.b32.xlu0 %v3068_v54, %s2835_s4 }
0x2d1d   :  { %v2024_v37 = vpop.permute.xlu0 %2023 }
0x2d1e   :  { %v2026_v38 = vmul.f32 %v2681_v30, %v2024_v37 }
0x2d20   :  { %2028 = vrot.lane.b32.xlu1 %v2026_v38, %s2834_s20 }
0x2d21   :  { %v1100_v39 = vpop.permute.xlu0 %1099 }
0x2d22   :  { %1102 = vst.msk [vmem:[#allocation12] sm:$0x3] %vm374_vm5, %v1100_v39 }
0x2d24   :  { %2034 = vrot.lane.b32.xlu1 %v2020_v35, %s2835_s4 }
0x2d92   :  { %v2029_v40 = vpop.permute.xlu1 %2028 }
0x2d93   :  { %2031 = vst.msk [vmem:[#allocation9 + $0xe] sm:$0x3] %vm374_vm5, %v2029_v40  ;;  %2032 = vst.msk [vmem:[#allocation10 + $0x2] sm:$0x3] %vm374_vm5, %v2029_v40 }
0x2d94   :  { %2761 = shalt.err (!%p2758_p0)
}
0x2d95   :  { %s2762_s17 = scalar_lea.hbm %s3257_s8, 64 }
0x2d96   :  { %p2763_p1 = scmp.ne.s32.totalorder %s3257_s8, %s2762_s17  ;;  %p2766_p2 = scmp.lt.u32.totalorder %s2762_s17, %s3257_s8 }
0x2d98   :  { %p2768_p3 = pnand %p2766_p2, %p2763_p1 }
0x2d9a   :  { %2771 = shalt.err (!%p2768_p3)
}
0x2d9b   :  { %2059 = dma.vmem_to_hbm [thread:$0]  %s2057_s11, 64, %s3257_s8, [#allocation11]  }
0x2d9c   :  { %s2772_s1 = scalar_lea.vmem %s3193_s3, 256  ;;  %p2777_p5 = scmp.lt.s32.totalorder %s3193_s3, %s3193_s3 }
0x2d9d   :  { %p2773_p4 = scmp.ne.s32.totalorder %s3193_s3, %s2772_s1  ;;  %p2778_p6 = scmp.lt.s32.totalorder %s2772_s1, %s2772_s1 }
0x2d9f   :  { %p2779_p7 = por %p2778_p6, %p2777_p5 }
0x2da1   :  { %p2780_p8 = pnand %p2779_p7, %p2773_p4 }
0x2da3   :  { %2783 = shalt.err (!%p2780_p8)
}
0x2da4   :  { %s2784_s27 = scalar_lea.hbm %s3256_s7, 256 }
0x2da5   :  { %p2785_p9 = scmp.ne.s32.totalorder %s3256_s7, %s2784_s27  ;;  %p2788_p10 = scmp.lt.u32.totalorder %s2784_s27, %s3256_s7 }
0x2da7   :  { %p2790_p11 = pnand %p2788_p10, %p2785_p9 }
0x2da9   :  { %2793 = shalt.err (!%p2790_p11)
}
0x2daa   :  { %2049 = dma.vmem_to_hbm [thread:$0]  %s3193_s3, 256, %s3256_s7, [#allocation5], %s2826_s21, %s2826_s21, %s2827_s22   ;;  %v2035_v54 = vpop.permute.xlu1 %2034 }
0x2dab   :  { %2037 = vst.msk [vmem:[#allocation12 + $0x2] sm:$0x3] %vm374_vm5, %v2035_v54  ;;  %s2794_s4 = scalar_lea.vmem %s3197_s14, 64  ;;  %p2799_p13 = scmp.lt.s32.totalorder %s3197_s14, %s3197_s14 }
0x2dac   :  { %p2795_p12 = scmp.ne.s32.totalorder %s3197_s14, %s2794_s4  ;;  %p2800_p0 = scmp.lt.s32.totalorder %s2794_s4, %s2794_s4 }
0x2dae   :  { %p2801_p1 = por %p2800_p0, %p2799_p13 }
0x2db0   :  { %p2802_p2 = pnand %p2801_p1, %p2795_p12 }
0x2db2   :  { %2805 = shalt.err (!%p2802_p2)
}
0x2db3   :  { %s2806_s13 = scalar_lea.hbm %s3258_s9, 64 }
0x2db4   :  { %p2807_p3 = scmp.ne.s32.totalorder %s3258_s9, %s2806_s13  ;;  %p2810_p4 = scmp.lt.u32.totalorder %s2806_s13, %s3258_s9 }
0x2db6   :  { %p2812_p5 = pnand %p2810_p4, %p2807_p3 }
0x2db8   :  { %2815 = shalt.err (!%p2812_p5)
}
0x2db9   :  { %2069 = dma.vmem_to_hbm [thread:$0]  %s3197_s14, 64, %s3258_s9, [#allocation11]  }
0x2dba   :  { %2820 = dma.done.wait [#allocation5], 256  }
0x2dbb   :  { %2821 = vsyncadd [#allocation5], 4294967040 }
0x2dbc   :  { %2822 = dma.done.wait [#allocation11], 128  }
0x2dbd   :  { %2823 = vsyncadd [#allocation11], 4294967168 }
0x2dbe   :  { %2079 = vsyncpa [#allocation4], 1 }
0x2dbf   :  { %2080 = vsyncpa [#allocation7], 1 }
0x2dc0   :  { %2081 = vsyncpa [#allocation5], 1 }
0x2dc1   :  { %2082 = vsyncpa [#allocation11], 1 }

</bundles_post_ra>
